<compile_context>
chip_gen: v6e
topology: v6e:2x2x1
jax: 0.10.0
libtpu: 0.0.40
codegen_flags: <defaults>
</compile_context>

<pallas_src>
import functools

import jax
import jax.numpy as jnp
from jax.experimental import pallas as pl
from jax.experimental.pallas import tpu as pltpu

BN_EPS = 1e-5
LANE = 128                      # channel padding target (lane width)
MAX_TM = 1024                   # max rows per grid tile (fits all VMEM budgets)
VMEM_LIMIT = 32 * 1024 * 1024   # explicit scoped-VMEM limit, headroom on v7x


def _round_up(x, m):
    return (x + m - 1) // m * m


# ----------------------------------------------------------------------------
# Pallas kernels
# ----------------------------------------------------------------------------
def _matmul_bias_relu_kernel(x_ref, w_ref, b_ref, o_ref):
    # o = relu(x @ w + b); BN scale already folded into w.
    y = jnp.dot(x_ref[...], w_ref[...], preferred_element_type=jnp.float32)
    o_ref[...] = jnp.maximum(y + b_ref[...], 0.0).astype(o_ref.dtype)


def _dw_pw_kernel(p_ref, dww_ref, dwb_ref, pww_ref, pwb_ref, o_ref):
    # Fused depthwise(3x3)+BN+ReLU  ->  pointwise(1x1)+BN+ReLU.
    # p:   (9, TM, C)  bf16 im2col taps (tap-contiguous)
    # dww: (9, C) f32 depthwise taps (BN scale folded), dwb: (1, C) f32
    # pww: (C, Cout) bf16 (BN scale folded),            pwb: (1, Cout) f32
    dww = dww_ref[...]
    acc = p_ref[0].astype(jnp.float32) * dww[0]
    for k in range(1, 9):
        acc = acc + p_ref[k].astype(jnp.float32) * dww[k]
    h = jnp.maximum(acc + dwb_ref[...], 0.0)               # (TM, C) f32 in VMEM
    y = jnp.dot(h.astype(jnp.bfloat16), pww_ref[...],
                preferred_element_type=jnp.float32)
    o_ref[...] = jnp.maximum(y + pwb_ref[...], 0.0).astype(o_ref.dtype)


def _gap_fc_kernel(x_ref, w_ref, b_ref, o_ref, *, inv_hw):
    # Fused global-average-pool + Linear.
    # x: (TN, HW, C) bf16 -> mean over HW -> (TN, C) -> dot (C, NC) + bias.
    g = jnp.sum(x_ref[...].astype(jnp.float32), axis=1) * inv_hw
    y = jnp.dot(g.astype(jnp.bfloat16), w_ref[...],
                preferred_element_type=jnp.float32)
    o_ref[...] = y + b_ref[...]


# ----------------------------------------------------------------------------
# JAX glue: patch extraction (pure data movement), BN folding
# ----------------------------------------------------------------------------
def _extract_taps(x, stride):
    """x: (N, H, W, C) -> list of 9 taps, each (N, OH, OW, C), 3x3 kernel pad=1."""
    n, h, w, c = x.shape
    xp = jnp.pad(x, ((0, 0), (1, 1), (1, 1), (0, 0)))
    oh = (h + 2 - 3) // stride + 1
    ow = (w + 2 - 3) // stride + 1
    taps = []
    for kh in range(3):
        for kw in range(3):
            taps.append(
                xp[:,
                   kh: kh + stride * (oh - 1) + 1: stride,
                   kw: kw + stride * (ow - 1) + 1: stride,
                   :])
    return taps, oh, ow


def _fold_bn(gamma, beta, mean, var):
    scale = gamma / jnp.sqrt(var + BN_EPS)
    bias = beta - mean * scale
    return scale, bias


def _compiler_params():
    return pltpu.CompilerParams(
        dimension_semantics=("parallel",),
        vmem_limit_bytes=VMEM_LIMIT,
    )


# ----------------------------------------------------------------------------
# Layer wrappers
# ----------------------------------------------------------------------------
def conv_bn_relu(x, w_hwio, bn, stride, cout_pad=LANE):
    """Standard 3x3 conv + BN + ReLU.  x: (N,H,W,Cin), w: (3,3,Cin,Cout)."""
    n, _, _, cin = x.shape
    cout = w_hwio.shape[3]
    taps, oh, ow = _extract_taps(x, stride)
    m = n * oh * ow
    k = 9 * cin
    k_pad = _round_up(k, 8)

    tm = min(MAX_TM, _round_up(m, 8))
    m_pad = _round_up(m, tm)

    x2 = jnp.stack(taps, axis=3).reshape(m, k).astype(jnp.bfloat16)
    x2 = jnp.pad(x2, ((0, m_pad - m), (0, k_pad - k)))

    scale, bias = _fold_bn(*bn)
    w2 = w_hwio.reshape(k, cout) * scale[None, :]
    w2 = jnp.pad(w2, ((0, k_pad - k), (0, cout_pad - cout))).astype(jnp.bfloat16)
    b2 = jnp.pad(bias, (0, cout_pad - cout)).reshape(1, cout_pad).astype(jnp.float32)

    y = pl.pallas_call(
        _matmul_bias_relu_kernel,
        out_shape=jax.ShapeDtypeStruct((m_pad, cout_pad), jnp.bfloat16),
        grid_spec=pltpu.PrefetchScalarGridSpec(
            num_scalar_prefetch=0,
            grid=(m_pad // tm,),
            in_specs=[
                pl.BlockSpec((tm, k_pad), lambda i: (i, 0)),
                pl.BlockSpec((k_pad, cout_pad), lambda i: (0, 0)),
                pl.BlockSpec((1, cout_pad), lambda i: (0, 0)),
            ],
            out_specs=pl.BlockSpec((tm, cout_pad), lambda i: (i, 0)),
        ),
        compiler_params=_compiler_params(),
        cost_estimate=pl.CostEstimate(
            flops=2 * m_pad * k_pad * cout_pad,
            transcendentals=0,
            bytes_accessed=2 * (m_pad * k_pad + k_pad * cout_pad + m_pad * cout_pad),
        ),
    )(x2, w2, b2)
    return y[:m].reshape(n, oh, ow, cout_pad)


def conv_dw_fused(x, dw_w_hwc, dw_bn, pw_w_io, pw_bn, stride, cout_pad=LANE):
    """Fused depthwise 3x3 + BN + ReLU + pointwise 1x1 + BN + ReLU.

    x: (N,H,W,C_pad) with zero-padded channels; dw_w: (3,3,C); pw_w: (C,Cout).
    """
    n, _, _, c_pad = x.shape
    c = dw_w_hwc.shape[2]
    cout = pw_w_io.shape[1]
    taps, oh, ow = _extract_taps(x, stride)
    m = n * oh * ow
    tm = min(MAX_TM, _round_up(m, 8))
    m_pad = _round_up(m, tm)

    # (9, M_pad, C_pad) bf16: each tap is a contiguous (M, C) lane-dense tile.
    p = jnp.stack(taps, axis=0).reshape(9, m, c_pad).astype(jnp.bfloat16)
    p = jnp.pad(p, ((0, 0), (0, m_pad - m), (0, 0)))

    dw_scale, dw_bias = _fold_bn(*dw_bn)
    dww = dw_w_hwc.reshape(9, c) * dw_scale[None, :]
    dww = jnp.pad(dww, ((0, 0), (0, c_pad - c))).astype(jnp.float32)
    dwb = jnp.pad(dw_bias, (0, c_pad - c)).reshape(1, c_pad).astype(jnp.float32)

    pw_scale, pw_bias = _fold_bn(*pw_bn)
    pww = pw_w_io * pw_scale[None, :]
    pww = jnp.pad(pww, ((0, c_pad - c), (0, cout_pad - cout))).astype(jnp.bfloat16)
    pwb = jnp.pad(pw_bias, (0, cout_pad - cout)).reshape(1, cout_pad).astype(jnp.float32)

    y = pl.pallas_call(
        _dw_pw_kernel,
        out_shape=jax.ShapeDtypeStruct((m_pad, cout_pad), jnp.bfloat16),
        grid_spec=pltpu.PrefetchScalarGridSpec(
            num_scalar_prefetch=0,
            grid=(m_pad // tm,),
            in_specs=[
                pl.BlockSpec((9, tm, c_pad), lambda i: (0, i, 0)),
                pl.BlockSpec((9, c_pad), lambda i: (0, 0)),
                pl.BlockSpec((1, c_pad), lambda i: (0, 0)),
                pl.BlockSpec((c_pad, cout_pad), lambda i: (0, 0)),
                pl.BlockSpec((1, cout_pad), lambda i: (0, 0)),
            ],
            out_specs=pl.BlockSpec((tm, cout_pad), lambda i: (i, 0)),
        ),
        compiler_params=_compiler_params(),
        cost_estimate=pl.CostEstimate(
            flops=2 * m_pad * c_pad * (9 + cout_pad),
            transcendentals=0,
            bytes_accessed=2 * (9 * m_pad * c_pad + c_pad * cout_pad + m_pad * cout_pad),
        ),
    )(p, dww, dwb, pww, pwb)
    return y[:m].reshape(n, oh, ow, cout_pad)


def gap_fc(x, fc_w, fc_b):
    """Fused AdaptiveAvgPool2d((1,1)) + view + Linear.  x: (N,H,W,128)."""
    n, h, w, c_pad = x.shape
    hw = h * w
    num_classes = fc_w.shape[1]
    nc_pad = _round_up(num_classes, LANE)

    tn = min(128, _round_up(n, 8))
    n_pad = _round_up(n, tn)

    xg = jnp.pad(x.reshape(n, hw, c_pad).astype(jnp.bfloat16),
                 ((0, n_pad - n), (0, 0), (0, 0)))
    wf = jnp.pad(fc_w, ((0, c_pad - fc_w.shape[0]), (0, nc_pad - num_classes)))
    wf = wf.astype(jnp.bfloat16)
    bf = jnp.pad(fc_b.reshape(1, -1),
                 ((0, 0), (0, nc_pad - num_classes))).astype(jnp.float32)

    y = pl.pallas_call(
        functools.partial(_gap_fc_kernel, inv_hw=1.0 / hw),
        out_shape=jax.ShapeDtypeStruct((n_pad, nc_pad), jnp.float32),
        grid_spec=pltpu.PrefetchScalarGridSpec(
            num_scalar_prefetch=0,
            grid=(n_pad // tn,),
            in_specs=[
                pl.BlockSpec((tn, hw, c_pad), lambda i: (i, 0, 0)),
                pl.BlockSpec((c_pad, nc_pad), lambda i: (0, 0)),
                pl.BlockSpec((1, nc_pad), lambda i: (0, 0)),
            ],
            out_specs=pl.BlockSpec((tn, nc_pad), lambda i: (i, 0)),
        ),
        compiler_params=_compiler_params(),
        cost_estimate=pl.CostEstimate(
            flops=n_pad * hw * c_pad + 2 * n_pad * c_pad * nc_pad,
            transcendentals=0,
            bytes_accessed=2 * (n_pad * hw * c_pad + c_pad * nc_pad) + 4 * n_pad * nc_pad,
        ),
    )(xg, wf, bf)
    return y[:n, :num_classes]


# ----------------------------------------------------------------------------
# Deterministic parameter init (shapes from SuperLightMobileNet.__init__)
# ----------------------------------------------------------------------------
def init_params(key, num_classes):
    keys = iter(jax.random.split(key, 32))   # 27 keys consumed

    def nxt():
        return next(keys)

    def bn_params(c):
        gamma = 1.0 + 0.1 * jax.random.normal(nxt(), (c,), jnp.float32)
        beta = 0.05 * jax.random.normal(nxt(), (c,), jnp.float32)
        mean = 0.1 * jax.random.normal(nxt(), (c,), jnp.float32)
        var = 1.0 + 0.1 * jnp.abs(jax.random.normal(nxt(), (c,), jnp.float32))
        return gamma, beta, mean, var

    p = {}
    # conv_bn(3, 32, 2): Conv2d(3,32,3,2,1,bias=False) + BN + ReLU
    p["c1_w"] = 0.1 * jax.random.normal(nxt(), (3, 3, 3, 32), jnp.float32)
    p["c1_bn"] = bn_params(32)
    # conv_dw(32, 64, 1): depthwise 3x3 (32) + BN + ReLU + pointwise 32->64 + BN + ReLU
    p["dw1_w"] = 0.1 * jax.random.normal(nxt(), (3, 3, 32), jnp.float32)
    p["dw1_bn"] = bn_params(32)
    p["pw1_w"] = 0.1 * jax.random.normal(nxt(), (32, 64), jnp.float32)
    p["pw1_bn"] = bn_params(64)
    # conv_dw(64, 128, 2)
    p["dw2_w"] = 0.1 * jax.random.normal(nxt(), (3, 3, 64), jnp.float32)
    p["dw2_bn"] = bn_params(64)
    p["pw2_w"] = 0.1 * jax.random.normal(nxt(), (64, 128), jnp.float32)
    p["pw2_bn"] = bn_params(128)
    # fc: Linear(128, num_classes)
    p["fc_w"] = 0.05 * jax.random.normal(nxt(), (128, num_classes), jnp.float32)
    p["fc_b"] = 0.01 * jax.random.normal(nxt(), (num_classes,), jnp.float32)
    return p


# ----------------------------------------------------------------------------
# Forward pass (mirrors SuperLightMobileNet.forward)
# ----------------------------------------------------------------------------
def super_light_mobilenet_forward(params, x_nchw):
    x = jnp.transpose(x_nchw, (0, 2, 3, 1)).astype(jnp.float32)   # NCHW -> NHWC

    # conv_bn(3, 32, stride=2)
    x = conv_bn_relu(x, params["c1_w"], params["c1_bn"], stride=2)
    # conv_dw(32, 64, stride=1)   -- depthwise + pointwise fused
    x = conv_dw_fused(x, params["dw1_w"], params["dw1_bn"],
                      params["pw1_w"], params["pw1_bn"], stride=1)
    # conv_dw(64, 128, stride=2)  -- depthwise + pointwise fused
    x = conv_dw_fused(x, params["dw2_w"], params["dw2_bn"],
                      params["pw2_w"], params["pw2_bn"], stride=2)
    # AdaptiveAvgPool2d((1,1)) + view(-1, 128) + fc  (fused)
    return gap_fc(x, params["fc_w"], params["fc_b"])               # (N, num_classes)


if __name__ == "__main__":
    num_classes = 1000
    key = jax.random.PRNGKey(0)
    k_params, k_input = jax.random.split(key)

    params = init_params(k_params, num_classes)
    x = jax.random.normal(k_input, (2, 3, 16, 16), jnp.float32)    # NCHW input

    out = jax.jit(super_light_mobilenet_forward)(params, x)
    out = jax.block_until_ready(out)

    assert out.shape == (2, num_classes), out.shape
    assert out.dtype == jnp.float32
    assert bool(jnp.all(jnp.isfinite(out)))
    print("KERNEL_OK")
</pallas_src>

<mosaic_0001>
module attributes {stable_mosaic.version = 11 : i64} {
  func.func @_matmul_bias_relu_kernel(%arg0: i32, %arg1: memref<128x32xbf16, #tpu.memory_space<vmem>>, %arg2: memref<32x128xbf16, #tpu.memory_space<vmem>>, %arg3: memref<1x128xf32, #tpu.memory_space<vmem>>, %arg4: memref<128x128xbf16, #tpu.memory_space<vmem>>) attributes {dimension_semantics = [#tpu.dimension_semantics<parallel>], iteration_bounds = array<i64: 1>, scalar_prefetch = 0 : i64, scratch_operands = 0 : i64, tpu.core_type = #tpu.core_type<tc>, window_params = [{transform_indices = @transform_0, window_bounds = array<i64: 128, 32>}, {pipeline_mode = #tpu.pipeline_mode<synchronous>, transform_indices = @transform_1, window_bounds = array<i64: 32, 128>}, {pipeline_mode = #tpu.pipeline_mode<synchronous>, transform_indices = @transform_2, window_bounds = array<i64: 1, 128>}, {transform_indices = @transform_3, window_bounds = array<i64: 128, 128>}]} {
    %c0 = arith.constant 0 : index
    %c0_0 = arith.constant 0 : index
    %0 = vector.load %arg1[%c0, %c0_0] : memref<128x32xbf16, #tpu.memory_space<vmem>>, vector<128x32xbf16>
    %c0_1 = arith.constant 0 : index
    %c0_2 = arith.constant 0 : index
    %1 = vector.load %arg2[%c0_1, %c0_2] : memref<32x128xbf16, #tpu.memory_space<vmem>>, vector<32x128xbf16>
    %cst = arith.constant dense<0.000000e+00> : vector<128x128xf32>
    %2 = tpu.matmul %0, %1, %cst {dimension_numbers = #tpu.dot_dimension_numbers<[1], [0], [0], [1], [0, 0, 1, 1], [], []>} : vector<128x32xbf16>, vector<32x128xbf16>, vector<128x128xf32> -> vector<128x128xf32>
    %c0_3 = arith.constant 0 : index
    %c0_4 = arith.constant 0 : index
    %3 = vector.load %arg3[%c0_3, %c0_4] : memref<1x128xf32, #tpu.memory_space<vmem>>, vector<1x128xf32>
    %4 = vector.broadcast %3 : vector<1x128xf32> to vector<128x128xf32>
    %5 = arith.addf %2, %4 : vector<128x128xf32>
    %cst_5 = arith.constant 0.000000e+00 : f32
    %6 = vector.broadcast %cst_5 : f32 to vector<128x128xf32>
    %7 = arith.maximumf %5, %6 : vector<128x128xf32>
    %8 = arith.truncf %7 : vector<128x128xf32> to vector<128x128xbf16>
    %c0_6 = arith.constant 0 : index
    %c0_7 = arith.constant 0 : index
    %9 = vector.load %arg4[%c0_6, %c0_7] : memref<128x128xbf16, #tpu.memory_space<vmem>>, vector<128x128xbf16>
    tpu.vector_store %arg4[%c0_6, %c0_7], %8 {strides = array<i32>} : memref<128x128xbf16, #tpu.memory_space<vmem>>, vector<128x128xbf16>,
    return
  }
  func.func @transform_0(%arg0: i32) -> (i32, i32) {
    %c0_i32 = arith.constant 0 : i32
    %c0_i32_0 = arith.constant 0 : i32
    return %arg0, %c0_i32 : i32, i32
  }
  func.func @transform_1(%arg0: i32) -> (i32, i32) {
    %c0_i32 = arith.constant 0 : i32
    %c0_i32_0 = arith.constant 0 : i32
    %c0_i32_1 = arith.constant 0 : i32
    return %c0_i32, %c0_i32_0 : i32, i32
  }
  func.func @transform_2(%arg0: i32) -> (i32, i32) {
    %c0_i32 = arith.constant 0 : i32
    %c0_i32_0 = arith.constant 0 : i32
    %c0_i32_1 = arith.constant 0 : i32
    return %c0_i32, %c0_i32_0 : i32, i32
  }
  func.func @transform_3(%arg0: i32) -> (i32, i32) {
    %c0_i32 = arith.constant 0 : i32
    %c0_i32_0 = arith.constant 0 : i32
    return %arg0, %c0_i32 : i32, i32
  }
}

module attributes {stable_mosaic.version = 11 : i64} {
  func.func @_dw_pw_kernel(%arg0: i32, %arg1: memref<9x128x128xbf16, #tpu.memory_space<vmem>>, %arg2: memref<9x128xf32, #tpu.memory_space<vmem>>, %arg3: memref<1x128xf32, #tpu.memory_space<vmem>>, %arg4: memref<128x128xbf16, #tpu.memory_space<vmem>>, %arg5: memref<1x128xf32, #tpu.memory_space<vmem>>, %arg6: memref<128x128xbf16, #tpu.memory_space<vmem>>) attributes {dimension_semantics = [#tpu.dimension_semantics<parallel>], iteration_bounds = array<i64: 1>, scalar_prefetch = 0 : i64, scratch_operands = 0 : i64, tpu.core_type = #tpu.core_type<tc>, window_params = [{transform_indices = @transform_0, window_bounds = array<i64: 9, 128, 128>}, {pipeline_mode = #tpu.pipeline_mode<synchronous>, transform_indices = @transform_1, window_bounds = array<i64: 9, 128>}, {pipeline_mode = #tpu.pipeline_mode<synchronous>, transform_indices = @transform_2, window_bounds = array<i64: 1, 128>}, {pipeline_mode = #tpu.pipeline_mode<synchronous>, transform_indices = @transform_3, window_bounds = array<i64: 128, 128>}, {pipeline_mode = #tpu.pipeline_mode<synchronous>, transform_indices = @transform_4, window_bounds = array<i64: 1, 128>}, {transform_indices = @transform_5, window_bounds = array<i64: 128, 128>}]} {
    %c0 = arith.constant 0 : index
    %c0_0 = arith.constant 0 : index
    %0 = vector.load %arg2[%c0, %c0_0] : memref<9x128xf32, #tpu.memory_space<vmem>>, vector<9x128xf32>
    %c0_1 = arith.constant 0 : index
    %c0_2 = arith.constant 0 : index
    %c0_3 = arith.constant 0 : index
    %1 = vector.load %arg1[%c0_1, %c0_2, %c0_3] : memref<9x128x128xbf16, #tpu.memory_space<vmem>>, vector<1x128x128xbf16>
    %2 = vector.shape_cast %1 : vector<1x128x128xbf16> to vector<128x128xbf16>
    %3 = arith.extf %2 : vector<128x128xbf16> to vector<128x128xf32>
    %4 = vector.extract_strided_slice %0 {offsets = [0, 0], sizes = [1, 128], strides = [1, 1]} : vector<9x128xf32> to vector<1x128xf32>
    %5 = vector.shape_cast %4 : vector<1x128xf32> to vector<128xf32>
    %6 = vector.shape_cast %5 : vector<128xf32> to vector<1x128xf32>
    %7 = vector.broadcast %6 : vector<1x128xf32> to vector<128x128xf32>
    %8 = arith.mulf %3, %7 : vector<128x128xf32>
    %c1 = arith.constant 1 : index
    %c0_4 = arith.constant 0 : index
    %c0_5 = arith.constant 0 : index
    %9 = vector.load %arg1[%c1, %c0_4, %c0_5] : memref<9x128x128xbf16, #tpu.memory_space<vmem>>, vector<1x128x128xbf16>
    %10 = vector.shape_cast %9 : vector<1x128x128xbf16> to vector<128x128xbf16>
    %11 = arith.extf %10 : vector<128x128xbf16> to vector<128x128xf32>
    %12 = vector.extract_strided_slice %0 {offsets = [1, 0], sizes = [1, 128], strides = [1, 1]} : vector<9x128xf32> to vector<1x128xf32>
    %13 = vector.shape_cast %12 : vector<1x128xf32> to vector<128xf32>
    %14 = vector.shape_cast %13 : vector<128xf32> to vector<1x128xf32>
    %15 = vector.broadcast %14 : vector<1x128xf32> to vector<128x128xf32>
    %16 = arith.mulf %11, %15 : vector<128x128xf32>
    %17 = arith.addf %8, %16 : vector<128x128xf32>
    %c2 = arith.constant 2 : index
    %c0_6 = arith.constant 0 : index
    %c0_7 = arith.constant 0 : index
    %18 = vector.load %arg1[%c2, %c0_6, %c0_7] : memref<9x128x128xbf16, #tpu.memory_space<vmem>>, vector<1x128x128xbf16>
    %19 = vector.shape_cast %18 : vector<1x128x128xbf16> to vector<128x128xbf16>
    %20 = arith.extf %19 : vector<128x128xbf16> to vector<128x128xf32>
    %21 = vector.extract_strided_slice %0 {offsets = [2, 0], sizes = [1, 128], strides = [1, 1]} : vector<9x128xf32> to vector<1x128xf32>
    %22 = vector.shape_cast %21 : vector<1x128xf32> to vector<128xf32>
    %23 = vector.shape_cast %22 : vector<128xf32> to vector<1x128xf32>
    %24 = vector.broadcast %23 : vector<1x128xf32> to vector<128x128xf32>
    %25 = arith.mulf %20, %24 : vector<128x128xf32>
    %26 = arith.addf %17, %25 : vector<128x128xf32>
    %c3 = arith.constant 3 : index
    %c0_8 = arith.constant 0 : index
    %c0_9 = arith.constant 0 : index
    %27 = vector.load %arg1[%c3, %c0_8, %c0_9] : memref<9x128x128xbf16, #tpu.memory_space<vmem>>, vector<1x128x128xbf16>
    %28 = vector.shape_cast %27 : vector<1x128x128xbf16> to vector<128x128xbf16>
    %29 = arith.extf %28 : vector<128x128xbf16> to vector<128x128xf32>
    %30 = vector.extract_strided_slice %0 {offsets = [3, 0], sizes = [1, 128], strides = [1, 1]} : vector<9x128xf32> to vector<1x128xf32>
    %31 = vector.shape_cast %30 : vector<1x128xf32> to vector<128xf32>
    %32 = vector.shape_cast %31 : vector<128xf32> to vector<1x128xf32>
    %33 = vector.broadcast %32 : vector<1x128xf32> to vector<128x128xf32>
    %34 = arith.mulf %29, %33 : vector<128x128xf32>
    %35 = arith.addf %26, %34 : vector<128x128xf32>
    %c4 = arith.constant 4 : index
    %c0_10 = arith.constant 0 : index
    %c0_11 = arith.constant 0 : index
    %36 = vector.load %arg1[%c4, %c0_10, %c0_11] : memref<9x128x128xbf16, #tpu.memory_space<vmem>>, vector<1x128x128xbf16>
    %37 = vector.shape_cast %36 : vector<1x128x128xbf16> to vector<128x128xbf16>
    %38 = arith.extf %37 : vector<128x128xbf16> to vector<128x128xf32>
    %39 = vector.extract_strided_slice %0 {offsets = [4, 0], sizes = [1, 128], strides = [1, 1]} : vector<9x128xf32> to vector<1x128xf32>
    %40 = vector.shape_cast %39 : vector<1x128xf32> to vector<128xf32>
    %41 = vector.shape_cast %40 : vector<128xf32> to vector<1x128xf32>
    %42 = vector.broadcast %41 : vector<1x128xf32> to vector<128x128xf32>
    %43 = arith.mulf %38, %42 : vector<128x128xf32>
    %44 = arith.addf %35, %43 : vector<128x128xf32>
    %c5 = arith.constant 5 : index
    %c0_12 = arith.constant 0 : index
    %c0_13 = arith.constant 0 : index
    %45 = vector.load %arg1[%c5, %c0_12, %c0_13] : memref<9x128x128xbf16, #tpu.memory_space<vmem>>, vector<1x128x128xbf16>
    %46 = vector.shape_cast %45 : vector<1x128x128xbf16> to vector<128x128xbf16>
    %47 = arith.extf %46 : vector<128x128xbf16> to vector<128x128xf32>
    %48 = vector.extract_strided_slice %0 {offsets = [5, 0], sizes = [1, 128], strides = [1, 1]} : vector<9x128xf32> to vector<1x128xf32>
    %49 = vector.shape_cast %48 : vector<1x128xf32> to vector<128xf32>
    %50 = vector.shape_cast %49 : vector<128xf32> to vector<1x128xf32>
    %51 = vector.broadcast %50 : vector<1x128xf32> to vector<128x128xf32>
    %52 = arith.mulf %47, %51 : vector<128x128xf32>
    %53 = arith.addf %44, %52 : vector<128x128xf32>
    %c6 = arith.constant 6 : index
    %c0_14 = arith.constant 0 : index
    %c0_15 = arith.constant 0 : index
    %54 = vector.load %arg1[%c6, %c0_14, %c0_15] : memref<9x128x128xbf16, #tpu.memory_space<vmem>>, vector<1x128x128xbf16>
    %55 = vector.shape_cast %54 : vector<1x128x128xbf16> to vector<128x128xbf16>
    %56 = arith.extf %55 : vector<128x128xbf16> to vector<128x128xf32>
    %57 = vector.extract_strided_slice %0 {offsets = [6, 0], sizes = [1, 128], strides = [1, 1]} : vector<9x128xf32> to vector<1x128xf32>
    %58 = vector.shape_cast %57 : vector<1x128xf32> to vector<128xf32>
    %59 = vector.shape_cast %58 : vector<128xf32> to vector<1x128xf32>
    %60 = vector.broadcast %59 : vector<1x128xf32> to vector<128x128xf32>
    %61 = arith.mulf %56, %60 : vector<128x128xf32>
    %62 = arith.addf %53, %61 : vector<128x128xf32>
    %c7 = arith.constant 7 : index
    %c0_16 = arith.constant 0 : index
    %c0_17 = arith.constant 0 : index
    %63 = vector.load %arg1[%c7, %c0_16, %c0_17] : memref<9x128x128xbf16, #tpu.memory_space<vmem>>, vector<1x128x128xbf16>
    %64 = vector.shape_cast %63 : vector<1x128x128xbf16> to vector<128x128xbf16>
    %65 = arith.extf %64 : vector<128x128xbf16> to vector<128x128xf32>
    %66 = vector.extract_strided_slice %0 {offsets = [7, 0], sizes = [1, 128], strides = [1, 1]} : vector<9x128xf32> to vector<1x128xf32>
    %67 = vector.shape_cast %66 : vector<1x128xf32> to vector<128xf32>
    %68 = vector.shape_cast %67 : vector<128xf32> to vector<1x128xf32>
    %69 = vector.broadcast %68 : vector<1x128xf32> to vector<128x128xf32>
    %70 = arith.mulf %65, %69 : vector<128x128xf32>
    %71 = arith.addf %62, %70 : vector<128x128xf32>
    %c8 = arith.constant 8 : index
    %c0_18 = arith.constant 0 : index
    %c0_19 = arith.constant 0 : index
    %72 = vector.load %arg1[%c8, %c0_18, %c0_19] : memref<9x128x128xbf16, #tpu.memory_space<vmem>>, vector<1x128x128xbf16>
    %73 = vector.shape_cast %72 : vector<1x128x128xbf16> to vector<128x128xbf16>
    %74 = arith.extf %73 : vector<128x128xbf16> to vector<128x128xf32>
    %75 = vector.extract_strided_slice %0 {offsets = [8, 0], sizes = [1, 128], strides = [1, 1]} : vector<9x128xf32> to vector<1x128xf32>
    %76 = vector.shape_cast %75 : vector<1x128xf32> to vector<128xf32>
    %77 = vector.shape_cast %76 : vector<128xf32> to vector<1x128xf32>
    %78 = vector.broadcast %77 : vector<1x128xf32> to vector<128x128xf32>
    %79 = arith.mulf %74, %78 : vector<128x128xf32>
    %80 = arith.addf %71, %79 : vector<128x128xf32>
    %c0_20 = arith.constant 0 : index
    %c0_21 = arith.constant 0 : index
    %81 = vector.load %arg3[%c0_20, %c0_21] : memref<1x128xf32, #tpu.memory_space<vmem>>, vector<1x128xf32>
    %82 = vector.broadcast %81 : vector<1x128xf32> to vector<128x128xf32>
    %83 = arith.addf %80, %82 : vector<128x128xf32>
    %cst = arith.constant 0.000000e+00 : f32
    %84 = vector.broadcast %cst : f32 to vector<128x128xf32>
    %85 = arith.maximumf %83, %84 : vector<128x128xf32>
    %86 = arith.truncf %85 : vector<128x128xf32> to vector<128x128xbf16>
    %c0_22 = arith.constant 0 : index
    %c0_23 = arith.constant 0 : index
    %87 = vector.load %arg4[%c0_22, %c0_23] : memref<128x128xbf16, #tpu.memory_space<vmem>>, vector<128x128xbf16>
    %cst_24 = arith.constant dense<0.000000e+00> : vector<128x128xf32>
    %88 = tpu.matmul %86, %87, %cst_24 {dimension_numbers = #tpu.dot_dimension_numbers<[1], [0], [0], [1], [0, 0, 1, 1], [], []>} : vector<128x128xbf16>, vector<128x128xbf16>, vector<128x128xf32> -> vector<128x128xf32>
    %c0_25 = arith.constant 0 : index
    %c0_26 = arith.constant 0 : index
    %89 = vector.load %arg5[%c0_25, %c0_26] : memref<1x128xf32, #tpu.memory_space<vmem>>, vector<1x128xf32>
    %90 = vector.broadcast %89 : vector<1x128xf32> to vector<128x128xf32>
    %91 = arith.addf %88, %90 : vector<128x128xf32>
    %cst_27 = arith.constant 0.000000e+00 : f32
    %92 = vector.broadcast %cst_27 : f32 to vector<128x128xf32>
    %93 = arith.maximumf %91, %92 : vector<128x128xf32>
    %94 = arith.truncf %93 : vector<128x128xf32> to vector<128x128xbf16>
    %c0_28 = arith.constant 0 : index
    %c0_29 = arith.constant 0 : index
    %95 = vector.load %arg6[%c0_28, %c0_29] : memref<128x128xbf16, #tpu.memory_space<vmem>>, vector<128x128xbf16>
    tpu.vector_store %arg6[%c0_28, %c0_29], %94 {strides = array<i32>} : memref<128x128xbf16, #tpu.memory_space<vmem>>, vector<128x128xbf16>,
    return
  }
  func.func @transform_0(%arg0: i32) -> (i32, i32, i32) {
    %c0_i32 = arith.constant 0 : i32
    %c0_i32_0 = arith.constant 0 : i32
    %c0_i32_1 = arith.constant 0 : i32
    return %c0_i32, %arg0, %c0_i32_0 : i32, i32, i32
  }
  func.func @transform_1(%arg0: i32) -> (i32, i32) {
    %c0_i32 = arith.constant 0 : i32
    %c0_i32_0 = arith.constant 0 : i32
    %c0_i32_1 = arith.constant 0 : i32
    return %c0_i32, %c0_i32_0 : i32, i32
  }
  func.func @transform_2(%arg0: i32) -> (i32, i32) {
    %c0_i32 = arith.constant 0 : i32
    %c0_i32_0 = arith.constant 0 : i32
    %c0_i32_1 = arith.constant 0 : i32
    return %c0_i32, %c0_i32_0 : i32, i32
  }
  func.func @transform_3(%arg0: i32) -> (i32, i32) {
    %c0_i32 = arith.constant 0 : i32
    %c0_i32_0 = arith.constant 0 : i32
    %c0_i32_1 = arith.constant 0 : i32
    return %c0_i32, %c0_i32_0 : i32, i32
  }
  func.func @transform_4(%arg0: i32) -> (i32, i32) {
    %c0_i32 = arith.constant 0 : i32
    %c0_i32_0 = arith.constant 0 : i32
    %c0_i32_1 = arith.constant 0 : i32
    return %c0_i32, %c0_i32_0 : i32, i32
  }
  func.func @transform_5(%arg0: i32) -> (i32, i32) {
    %c0_i32 = arith.constant 0 : i32
    %c0_i32_0 = arith.constant 0 : i32
    return %arg0, %c0_i32 : i32, i32
  }
}

module attributes {stable_mosaic.version = 11 : i64} {
  func.func @_dw_pw_kernel(%arg0: i32, %arg1: memref<9x32x128xbf16, #tpu.memory_space<vmem>>, %arg2: memref<9x128xf32, #tpu.memory_space<vmem>>, %arg3: memref<1x128xf32, #tpu.memory_space<vmem>>, %arg4: memref<128x128xbf16, #tpu.memory_space<vmem>>, %arg5: memref<1x128xf32, #tpu.memory_space<vmem>>, %arg6: memref<32x128xbf16, #tpu.memory_space<vmem>>) attributes {dimension_semantics = [#tpu.dimension_semantics<parallel>], iteration_bounds = array<i64: 1>, scalar_prefetch = 0 : i64, scratch_operands = 0 : i64, tpu.core_type = #tpu.core_type<tc>, window_params = [{transform_indices = @transform_0, window_bounds = array<i64: 9, 32, 128>}, {pipeline_mode = #tpu.pipeline_mode<synchronous>, transform_indices = @transform_1, window_bounds = array<i64: 9, 128>}, {pipeline_mode = #tpu.pipeline_mode<synchronous>, transform_indices = @transform_2, window_bounds = array<i64: 1, 128>}, {pipeline_mode = #tpu.pipeline_mode<synchronous>, transform_indices = @transform_3, window_bounds = array<i64: 128, 128>}, {pipeline_mode = #tpu.pipeline_mode<synchronous>, transform_indices = @transform_4, window_bounds = array<i64: 1, 128>}, {transform_indices = @transform_5, window_bounds = array<i64: 32, 128>}]} {
    %c0 = arith.constant 0 : index
    %c0_0 = arith.constant 0 : index
    %0 = vector.load %arg2[%c0, %c0_0] : memref<9x128xf32, #tpu.memory_space<vmem>>, vector<9x128xf32>
    %c0_1 = arith.constant 0 : index
    %c0_2 = arith.constant 0 : index
    %c0_3 = arith.constant 0 : index
    %1 = vector.load %arg1[%c0_1, %c0_2, %c0_3] : memref<9x32x128xbf16, #tpu.memory_space<vmem>>, vector<1x32x128xbf16>
    %2 = vector.shape_cast %1 : vector<1x32x128xbf16> to vector<32x128xbf16>
    %3 = arith.extf %2 : vector<32x128xbf16> to vector<32x128xf32>
    %4 = vector.extract_strided_slice %0 {offsets = [0, 0], sizes = [1, 128], strides = [1, 1]} : vector<9x128xf32> to vector<1x128xf32>
    %5 = vector.shape_cast %4 : vector<1x128xf32> to vector<128xf32>
    %6 = vector.shape_cast %5 : vector<128xf32> to vector<1x128xf32>
    %7 = vector.broadcast %6 : vector<1x128xf32> to vector<32x128xf32>
    %8 = arith.mulf %3, %7 : vector<32x128xf32>
    %c1 = arith.constant 1 : index
    %c0_4 = arith.constant 0 : index
    %c0_5 = arith.constant 0 : index
    %9 = vector.load %arg1[%c1, %c0_4, %c0_5] : memref<9x32x128xbf16, #tpu.memory_space<vmem>>, vector<1x32x128xbf16>
    %10 = vector.shape_cast %9 : vector<1x32x128xbf16> to vector<32x128xbf16>
    %11 = arith.extf %10 : vector<32x128xbf16> to vector<32x128xf32>
    %12 = vector.extract_strided_slice %0 {offsets = [1, 0], sizes = [1, 128], strides = [1, 1]} : vector<9x128xf32> to vector<1x128xf32>
    %13 = vector.shape_cast %12 : vector<1x128xf32> to vector<128xf32>
    %14 = vector.shape_cast %13 : vector<128xf32> to vector<1x128xf32>
    %15 = vector.broadcast %14 : vector<1x128xf32> to vector<32x128xf32>
    %16 = arith.mulf %11, %15 : vector<32x128xf32>
    %17 = arith.addf %8, %16 : vector<32x128xf32>
    %c2 = arith.constant 2 : index
    %c0_6 = arith.constant 0 : index
    %c0_7 = arith.constant 0 : index
    %18 = vector.load %arg1[%c2, %c0_6, %c0_7] : memref<9x32x128xbf16, #tpu.memory_space<vmem>>, vector<1x32x128xbf16>
    %19 = vector.shape_cast %18 : vector<1x32x128xbf16> to vector<32x128xbf16>
    %20 = arith.extf %19 : vector<32x128xbf16> to vector<32x128xf32>
    %21 = vector.extract_strided_slice %0 {offsets = [2, 0], sizes = [1, 128], strides = [1, 1]} : vector<9x128xf32> to vector<1x128xf32>
    %22 = vector.shape_cast %21 : vector<1x128xf32> to vector<128xf32>
    %23 = vector.shape_cast %22 : vector<128xf32> to vector<1x128xf32>
    %24 = vector.broadcast %23 : vector<1x128xf32> to vector<32x128xf32>
    %25 = arith.mulf %20, %24 : vector<32x128xf32>
    %26 = arith.addf %17, %25 : vector<32x128xf32>
    %c3 = arith.constant 3 : index
    %c0_8 = arith.constant 0 : index
    %c0_9 = arith.constant 0 : index
    %27 = vector.load %arg1[%c3, %c0_8, %c0_9] : memref<9x32x128xbf16, #tpu.memory_space<vmem>>, vector<1x32x128xbf16>
    %28 = vector.shape_cast %27 : vector<1x32x128xbf16> to vector<32x128xbf16>
    %29 = arith.extf %28 : vector<32x128xbf16> to vector<32x128xf32>
    %30 = vector.extract_strided_slice %0 {offsets = [3, 0], sizes = [1, 128], strides = [1, 1]} : vector<9x128xf32> to vector<1x128xf32>
    %31 = vector.shape_cast %30 : vector<1x128xf32> to vector<128xf32>
    %32 = vector.shape_cast %31 : vector<128xf32> to vector<1x128xf32>
    %33 = vector.broadcast %32 : vector<1x128xf32> to vector<32x128xf32>
    %34 = arith.mulf %29, %33 : vector<32x128xf32>
    %35 = arith.addf %26, %34 : vector<32x128xf32>
    %c4 = arith.constant 4 : index
    %c0_10 = arith.constant 0 : index
    %c0_11 = arith.constant 0 : index
    %36 = vector.load %arg1[%c4, %c0_10, %c0_11] : memref<9x32x128xbf16, #tpu.memory_space<vmem>>, vector<1x32x128xbf16>
    %37 = vector.shape_cast %36 : vector<1x32x128xbf16> to vector<32x128xbf16>
    %38 = arith.extf %37 : vector<32x128xbf16> to vector<32x128xf32>
    %39 = vector.extract_strided_slice %0 {offsets = [4, 0], sizes = [1, 128], strides = [1, 1]} : vector<9x128xf32> to vector<1x128xf32>
    %40 = vector.shape_cast %39 : vector<1x128xf32> to vector<128xf32>
    %41 = vector.shape_cast %40 : vector<128xf32> to vector<1x128xf32>
    %42 = vector.broadcast %41 : vector<1x128xf32> to vector<32x128xf32>
    %43 = arith.mulf %38, %42 : vector<32x128xf32>
    %44 = arith.addf %35, %43 : vector<32x128xf32>
    %c5 = arith.constant 5 : index
    %c0_12 = arith.constant 0 : index
    %c0_13 = arith.constant 0 : index
    %45 = vector.load %arg1[%c5, %c0_12, %c0_13] : memref<9x32x128xbf16, #tpu.memory_space<vmem>>, vector<1x32x128xbf16>
    %46 = vector.shape_cast %45 : vector<1x32x128xbf16> to vector<32x128xbf16>
    %47 = arith.extf %46 : vector<32x128xbf16> to vector<32x128xf32>
    %48 = vector.extract_strided_slice %0 {offsets = [5, 0], sizes = [1, 128], strides = [1, 1]} : vector<9x128xf32> to vector<1x128xf32>
    %49 = vector.shape_cast %48 : vector<1x128xf32> to vector<128xf32>
    %50 = vector.shape_cast %49 : vector<128xf32> to vector<1x128xf32>
    %51 = vector.broadcast %50 : vector<1x128xf32> to vector<32x128xf32>
    %52 = arith.mulf %47, %51 : vector<32x128xf32>
    %53 = arith.addf %44, %52 : vector<32x128xf32>
    %c6 = arith.constant 6 : index
    %c0_14 = arith.constant 0 : index
    %c0_15 = arith.constant 0 : index
    %54 = vector.load %arg1[%c6, %c0_14, %c0_15] : memref<9x32x128xbf16, #tpu.memory_space<vmem>>, vector<1x32x128xbf16>
    %55 = vector.shape_cast %54 : vector<1x32x128xbf16> to vector<32x128xbf16>
    %56 = arith.extf %55 : vector<32x128xbf16> to vector<32x128xf32>
    %57 = vector.extract_strided_slice %0 {offsets = [6, 0], sizes = [1, 128], strides = [1, 1]} : vector<9x128xf32> to vector<1x128xf32>
    %58 = vector.shape_cast %57 : vector<1x128xf32> to vector<128xf32>
    %59 = vector.shape_cast %58 : vector<128xf32> to vector<1x128xf32>
    %60 = vector.broadcast %59 : vector<1x128xf32> to vector<32x128xf32>
    %61 = arith.mulf %56, %60 : vector<32x128xf32>
    %62 = arith.addf %53, %61 : vector<32x128xf32>
    %c7 = arith.constant 7 : index
    %c0_16 = arith.constant 0 : index
    %c0_17 = arith.constant 0 : index
    %63 = vector.load %arg1[%c7, %c0_16, %c0_17] : memref<9x32x128xbf16, #tpu.memory_space<vmem>>, vector<1x32x128xbf16>
    %64 = vector.shape_cast %63 : vector<1x32x128xbf16> to vector<32x128xbf16>
    %65 = arith.extf %64 : vector<32x128xbf16> to vector<32x128xf32>
    %66 = vector.extract_strided_slice %0 {offsets = [7, 0], sizes = [1, 128], strides = [1, 1]} : vector<9x128xf32> to vector<1x128xf32>
    %67 = vector.shape_cast %66 : vector<1x128xf32> to vector<128xf32>
    %68 = vector.shape_cast %67 : vector<128xf32> to vector<1x128xf32>
    %69 = vector.broadcast %68 : vector<1x128xf32> to vector<32x128xf32>
    %70 = arith.mulf %65, %69 : vector<32x128xf32>
    %71 = arith.addf %62, %70 : vector<32x128xf32>
    %c8 = arith.constant 8 : index
    %c0_18 = arith.constant 0 : index
    %c0_19 = arith.constant 0 : index
    %72 = vector.load %arg1[%c8, %c0_18, %c0_19] : memref<9x32x128xbf16, #tpu.memory_space<vmem>>, vector<1x32x128xbf16>
    %73 = vector.shape_cast %72 : vector<1x32x128xbf16> to vector<32x128xbf16>
    %74 = arith.extf %73 : vector<32x128xbf16> to vector<32x128xf32>
    %75 = vector.extract_strided_slice %0 {offsets = [8, 0], sizes = [1, 128], strides = [1, 1]} : vector<9x128xf32> to vector<1x128xf32>
    %76 = vector.shape_cast %75 : vector<1x128xf32> to vector<128xf32>
    %77 = vector.shape_cast %76 : vector<128xf32> to vector<1x128xf32>
    %78 = vector.broadcast %77 : vector<1x128xf32> to vector<32x128xf32>
    %79 = arith.mulf %74, %78 : vector<32x128xf32>
    %80 = arith.addf %71, %79 : vector<32x128xf32>
    %c0_20 = arith.constant 0 : index
    %c0_21 = arith.constant 0 : index
    %81 = vector.load %arg3[%c0_20, %c0_21] : memref<1x128xf32, #tpu.memory_space<vmem>>, vector<1x128xf32>
    %82 = vector.broadcast %81 : vector<1x128xf32> to vector<32x128xf32>
    %83 = arith.addf %80, %82 : vector<32x128xf32>
    %cst = arith.constant 0.000000e+00 : f32
    %84 = vector.broadcast %cst : f32 to vector<32x128xf32>
    %85 = arith.maximumf %83, %84 : vector<32x128xf32>
    %86 = arith.truncf %85 : vector<32x128xf32> to vector<32x128xbf16>
    %c0_22 = arith.constant 0 : index
    %c0_23 = arith.constant 0 : index
    %87 = vector.load %arg4[%c0_22, %c0_23] : memref<128x128xbf16, #tpu.memory_space<vmem>>, vector<128x128xbf16>
    %cst_24 = arith.constant dense<0.000000e+00> : vector<32x128xf32>
    %88 = tpu.matmul %86, %87, %cst_24 {dimension_numbers = #tpu.dot_dimension_numbers<[1], [0], [0], [1], [0, 0, 1, 1], [], []>} : vector<32x128xbf16>, vector<128x128xbf16>, vector<32x128xf32> -> vector<32x128xf32>
    %c0_25 = arith.constant 0 : index
    %c0_26 = arith.constant 0 : index
    %89 = vector.load %arg5[%c0_25, %c0_26] : memref<1x128xf32, #tpu.memory_space<vmem>>, vector<1x128xf32>
    %90 = vector.broadcast %89 : vector<1x128xf32> to vector<32x128xf32>
    %91 = arith.addf %88, %90 : vector<32x128xf32>
    %cst_27 = arith.constant 0.000000e+00 : f32
    %92 = vector.broadcast %cst_27 : f32 to vector<32x128xf32>
    %93 = arith.maximumf %91, %92 : vector<32x128xf32>
    %94 = arith.truncf %93 : vector<32x128xf32> to vector<32x128xbf16>
    %c0_28 = arith.constant 0 : index
    %c0_29 = arith.constant 0 : index
    %95 = vector.load %arg6[%c0_28, %c0_29] : memref<32x128xbf16, #tpu.memory_space<vmem>>, vector<32x128xbf16>
    tpu.vector_store %arg6[%c0_28, %c0_29], %94 {strides = array<i32>} : memref<32x128xbf16, #tpu.memory_space<vmem>>, vector<32x128xbf16>,
    return
  }
  func.func @transform_0(%arg0: i32) -> (i32, i32, i32) {
    %c0_i32 = arith.constant 0 : i32
    %c0_i32_0 = arith.constant 0 : i32
    %c0_i32_1 = arith.constant 0 : i32
    return %c0_i32, %arg0, %c0_i32_0 : i32, i32, i32
  }
  func.func @transform_1(%arg0: i32) -> (i32, i32) {
    %c0_i32 = arith.constant 0 : i32
    %c0_i32_0 = arith.constant 0 : i32
    %c0_i32_1 = arith.constant 0 : i32
    return %c0_i32, %c0_i32_0 : i32, i32
  }
  func.func @transform_2(%arg0: i32) -> (i32, i32) {
    %c0_i32 = arith.constant 0 : i32
    %c0_i32_0 = arith.constant 0 : i32
    %c0_i32_1 = arith.constant 0 : i32
    return %c0_i32, %c0_i32_0 : i32, i32
  }
  func.func @transform_3(%arg0: i32) -> (i32, i32) {
    %c0_i32 = arith.constant 0 : i32
    %c0_i32_0 = arith.constant 0 : i32
    %c0_i32_1 = arith.constant 0 : i32
    return %c0_i32, %c0_i32_0 : i32, i32
  }
  func.func @transform_4(%arg0: i32) -> (i32, i32) {
    %c0_i32 = arith.constant 0 : i32
    %c0_i32_0 = arith.constant 0 : i32
    %c0_i32_1 = arith.constant 0 : i32
    return %c0_i32, %c0_i32_0 : i32, i32
  }
  func.func @transform_5(%arg0: i32) -> (i32, i32) {
    %c0_i32 = arith.constant 0 : i32
    %c0_i32_0 = arith.constant 0 : i32
    return %arg0, %c0_i32 : i32, i32
  }
}

module attributes {stable_mosaic.version = 11 : i64} {
  func.func @_gap_fc_kernel(%arg0: i32, %arg1: memref<8x16x128xbf16, #tpu.memory_space<vmem>>, %arg2: memref<128x1024xbf16, #tpu.memory_space<vmem>>, %arg3: memref<1x1024xf32, #tpu.memory_space<vmem>>, %arg4: memref<8x1024xf32, #tpu.memory_space<vmem>>) attributes {dimension_semantics = [#tpu.dimension_semantics<parallel>], iteration_bounds = array<i64: 1>, scalar_prefetch = 0 : i64, scratch_operands = 0 : i64, tpu.core_type = #tpu.core_type<tc>, window_params = [{transform_indices = @transform_0, window_bounds = array<i64: 8, 16, 128>}, {pipeline_mode = #tpu.pipeline_mode<synchronous>, transform_indices = @transform_1, window_bounds = array<i64: 128, 1024>}, {pipeline_mode = #tpu.pipeline_mode<synchronous>, transform_indices = @transform_2, window_bounds = array<i64: 1, 1024>}, {transform_indices = @transform_3, window_bounds = array<i64: 8, 1024>}]} {
    %c0 = arith.constant 0 : index
    %c0_0 = arith.constant 0 : index
    %c0_1 = arith.constant 0 : index
    %0 = vector.load %arg1[%c0, %c0_0, %c0_1] : memref<8x16x128xbf16, #tpu.memory_space<vmem>>, vector<8x16x128xbf16>
    %1 = arith.extf %0 : vector<8x16x128xbf16> to vector<8x16x128xf32>
    %cst = arith.constant dense<0.000000e+00> : vector<8x128xf32>
    %2 = vector.multi_reduction <add>, %1, %cst [1] : vector<8x16x128xf32> to vector<8x128xf32>
    %cst_2 = arith.constant 6.250000e-02 : f32
    %3 = vector.broadcast %cst_2 : f32 to vector<8x128xf32>
    %4 = arith.mulf %2, %3 : vector<8x128xf32>
    %5 = arith.truncf %4 : vector<8x128xf32> to vector<8x128xbf16>
    %c0_3 = arith.constant 0 : index
    %c0_4 = arith.constant 0 : index
    %6 = vector.load %arg2[%c0_3, %c0_4] : memref<128x1024xbf16, #tpu.memory_space<vmem>>, vector<128x1024xbf16>
    %cst_5 = arith.constant dense<0.000000e+00> : vector<8x1024xf32>
    %7 = tpu.matmul %5, %6, %cst_5 {dimension_numbers = #tpu.dot_dimension_numbers<[1], [0], [0], [1], [0, 0, 1, 1], [], []>} : vector<8x128xbf16>, vector<128x1024xbf16>, vector<8x1024xf32> -> vector<8x1024xf32>
    %c0_6 = arith.constant 0 : index
    %c0_7 = arith.constant 0 : index
    %8 = vector.load %arg3[%c0_6, %c0_7] : memref<1x1024xf32, #tpu.memory_space<vmem>>, vector<1x1024xf32>
    %9 = vector.broadcast %8 : vector<1x1024xf32> to vector<8x1024xf32>
    %10 = arith.addf %7, %9 : vector<8x1024xf32>
    %c0_8 = arith.constant 0 : index
    %c0_9 = arith.constant 0 : index
    %11 = vector.load %arg4[%c0_8, %c0_9] : memref<8x1024xf32, #tpu.memory_space<vmem>>, vector<8x1024xf32>
    tpu.vector_store %arg4[%c0_8, %c0_9], %10 {strides = array<i32>} : memref<8x1024xf32, #tpu.memory_space<vmem>>, vector<8x1024xf32>,
    return
  }
  func.func @transform_0(%arg0: i32) -> (i32, i32, i32) {
    %c0_i32 = arith.constant 0 : i32
    %c0_i32_0 = arith.constant 0 : i32
    %c0_i32_1 = arith.constant 0 : i32
    return %arg0, %c0_i32, %c0_i32_0 : i32, i32, i32
  }
  func.func @transform_1(%arg0: i32) -> (i32, i32) {
    %c0_i32 = arith.constant 0 : i32
    %c0_i32_0 = arith.constant 0 : i32
    %c0_i32_1 = arith.constant 0 : i32
    return %c0_i32, %c0_i32_0 : i32, i32
  }
  func.func @transform_2(%arg0: i32) -> (i32, i32) {
    %c0_i32 = arith.constant 0 : i32
    %c0_i32_0 = arith.constant 0 : i32
    %c0_i32_1 = arith.constant 0 : i32
    return %c0_i32, %c0_i32_0 : i32, i32
  }
  func.func @transform_3(%arg0: i32) -> (i32, i32) {
    %c0_i32 = arith.constant 0 : i32
    %c0_i32_0 = arith.constant 0 : i32
    return %arg0, %c0_i32 : i32, i32
  }
}

</mosaic_0001>

<bundles_post_ra>
// kernel: super_light_mobilenet_forward.4
= control target key start
LH: loop header
LB: loop body
LE: loop exit
PB: predicated region body
PF: predicated region fallthrough
CT: control target
= control target key end

     0   :  { %vm94_vm0 = vcmask 261120   ;;  %s543_s1 = inlined_call_operand.vmem [shape: bf16[32,128], index: 1, kind: input, shape index: {}]   ;;  %s544_s0 = inlined_call_operand.vmem [shape: bf16[128,32], index: 0, kind: input, shape index: {}]   ;;  %s545_s2 = inlined_call_operand.vmem [shape: f32[1,128], index: 2, kind: input, shape index: {}]   ;;  %s546_s3 = inlined_call_operand.vmem [shape: bf16[128,128], index: 3, kind: output, shape index: {}]  }
   0x1   :  { %v448_v0 = vld [vmem:[%s543_s1 + $0x8] sm:$0xff]   ;;  %v449_v1 = vld [vmem:[%s543_s1] sm:$0xff]   ;;  %v454_v6 = vld [vmem:[%s544_s0 + $0x10] sm:$0xff]  }
   0x2   :  { %424 = vmatprep.subr.bf16.mxu0 %v448_v0  ;;  %444 = vmatprep.subr.bf16.mxu1 %v448_v0  ;;  %v450_v2 = vld [vmem:[%s544_s0] sm:$0xff]   ;;  %v452_v4 = vld [vmem:[%s544_s0 + $0x8] sm:$0xff]   ;;  %v455_v7 = vld [vmem:[%s544_s0 + $0x30] sm:$0xff]  }
   0x3   :  { %425 = vmatpush3.bf16.msra.mxu0 %v448_v0  ;;  %446 = vmatpush3.bf16.msra.mxu1 %v448_v0  ;;  %v451_v3 = vld [vmem:[%s544_s0 + $0x20] sm:$0xff]   ;;  %v453_v5 = vld [vmem:[%s544_s0 + $0x28] sm:$0xff]   ;;  %v456_v8 = vld [vmem:[%s544_s0 + $0x18] sm:$0xff]  }
   0x4   :  { %426 = vmatprep.subr.bf16.mxu0 %v449_v1  ;;  %445 = vmatprep.subr.bf16.mxu1 %v449_v1  ;;  %v457_v9 = vld [vmem:[%s544_s0 + $0x38] sm:$0xff]   ;;  %v316_v10 = vld [vmem:[%s545_s2] ss:$0 sm:$0xff] }
   0x5   :  { %428 = vmatprep.mubr.msk.bf16.mxu0 %vm94_vm0, %v450_v2  ;;  %436 = vmatprep.mubr.msk.bf16.mxu1 %vm94_vm0, %v451_v3 }
   0x7   :  { %427 = vmatpush3.bf16.msra.mxu0 %v449_v1  ;;  %447 = vmatpush3.bf16.msra.mxu1 %v449_v1 }
   0xa   :  { %429 = vmatmul.mubr.msk.bf16.vlgmr.msra.gmra.mxu0 %vm94_vm0, %v452_v4  ;;  %437 = vmatmul.mubr.msk.bf16.vlgmr.msra.gmra.mxu1 %vm94_vm0, %v453_v5 }
   0xb   :  { %432 = vmatprep.mubr.msk.bf16.mxu0 %vm94_vm0, %v454_v6  ;;  %440 = vmatprep.mubr.msk.bf16.mxu1 %vm94_vm0, %v455_v7 }
  0x12   :  { %433 = vmatmul.mubr.msk.bf16.gmra.mxu0 %vm94_vm0, %v456_v8  ;;  %441 = vmatmul.mubr.msk.bf16.gmra.mxu1 %vm94_vm0, %v457_v9 }
  0xca   :  { %v430_v11 = vpop.f32.mrf.mxu0  ;;  %v438_v12 = vpop.f32.mrf.mxu1 }
  0xcb   :  { %v162_v13 = vadd.f32 %v430_v11, %v316_v10  ;;  %v194_v14 = vadd.f32 %v438_v12, %v316_v10 }
  0xcc   :  { %v153_v15 = vpop.f32.mrf.mxu0  ;;  %v185_v16 = vpop.f32.mrf.mxu1 }
  0xcd   :  { %v154_v17 = vadd.f32 %v316_v10, %v153_v15  ;;  %v186_v18 = vadd.f32 %v316_v10, %v185_v16  ;;  %v218_v23 = vmax.f32 %v162_v13, 0.0  ;;  %v226_v24 = vmax.f32 %v194_v14, 0.0 }
  0xce   :  { %v431_v19 = vpop.f32.mrf.mxu0  ;;  %v439_v20 = vpop.f32.mrf.mxu1 }
  0xcf   :  { %v165_v21 = vadd.f32 %v431_v19, %v316_v10  ;;  %v197_v22 = vadd.f32 %v439_v20, %v316_v10  ;;  %v216_v31 = vmax.f32 %v154_v17, 0.0  ;;  %v224_v32 = vmax.f32 %v186_v18, 0.0 }
  0xd0   :  { %v156_v25 = vpop.f32.mrf.mxu0  ;;  %v188_v26 = vpop.f32.mrf.mxu1 }
  0xd1   :  { %v219_v27 = vmax.f32 %v165_v21, 0.0  ;;  %v227_v28 = vmax.f32 %v197_v22, 0.0  ;;  %v157_v29 = vadd.f32 %v316_v10, %v156_v25  ;;  %v189_v30 = vadd.f32 %v316_v10, %v188_v26 }
  0xd2   :  { %v434_v33 = vpop.f32.mrf.mxu0  ;;  %v442_v34 = vpop.f32.mrf.mxu1 }
  0xd3   :  { %v375_v35 = vpack.c.bf16 %v219_v27, %v218_v23  ;;  %v395_v36 = vpack.c.bf16 %v227_v28, %v226_v24  ;;  %v217_v37 = vmax.f32 %v157_v29, 0.0  ;;  %v225_v38 = vmax.f32 %v189_v30, 0.0 }
  0xd4   :  { %v178_v39 = vadd.f32 %v434_v33, %v316_v10  ;;  %v210_v40 = vadd.f32 %v442_v34, %v316_v10  ;;  %v169_v41 = vpop.f32.mrf.mxu0  ;;  %v201_v42 = vpop.f32.mrf.mxu1 }
  0xd5   :  { %407 = vst [vmem:[%s546_s3 + $0x8] sm:$0xff] %v375_v35   ;;  %411 = vst [vmem:[%s546_s3 + $0x28] sm:$0xff] %v395_v36   ;;  %v370_v43 = vpack.c.bf16 %v217_v37, %v216_v31  ;;  %v390_v44 = vpack.c.bf16 %v225_v38, %v224_v32  ;;  %v170_v45 = vadd.f32 %v316_v10, %v169_v41 }
  0xd6   :  { %v202_v46 = vadd.f32 %v316_v10, %v201_v42  ;;  %v435_v47 = vpop.f32.mrf.mxu0  ;;  %v443_v48 = vpop.f32.mrf.mxu1  ;;  %v222_v51 = vmax.f32 %v178_v39, 0.0  ;;  %v230_v52 = vmax.f32 %v210_v40, 0.0 }
  0xd7   :  { %371 = vst [vmem:[%s546_s3] sm:$0xff] %v370_v43   ;;  %410 = vst [vmem:[%s546_s3 + $0x20] sm:$0xff] %v390_v44   ;;  %v181_v49 = vadd.f32 %v435_v47, %v316_v10  ;;  %v213_v50 = vadd.f32 %v443_v48, %v316_v10  ;;  %v220_v59 = vmax.f32 %v170_v45, 0.0 }
  0xd8   :  { %v172_v53 = vpop.f32.mrf.mxu0  ;;  %v204_v54 = vpop.f32.mrf.mxu1  ;;  %v228_v60 = vmax.f32 %v202_v46, 0.0 }
  0xd9   :  { %v223_v55 = vmax.f32 %v181_v49, 0.0  ;;  %v231_v56 = vmax.f32 %v213_v50, 0.0  ;;  %v173_v57 = vadd.f32 %v316_v10, %v172_v53  ;;  %v205_v58 = vadd.f32 %v316_v10, %v204_v54 }
  0xdb   :  { %v385_v61 = vpack.c.bf16 %v223_v55, %v222_v51  ;;  %v405_v62 = vpack.c.bf16 %v231_v56, %v230_v52  ;;  %v221_v63 = vmax.f32 %v173_v57, 0.0  ;;  %v229_v0 = vmax.f32 %v205_v58, 0.0 }
  0xdd   :  { %409 = vst [vmem:[%s546_s3 + $0x18] sm:$0xff] %v385_v61   ;;  %413 = vst [vmem:[%s546_s3 + $0x38] sm:$0xff] %v405_v62   ;;  %v380_v1 = vpack.c.bf16 %v221_v63, %v220_v59  ;;  %v400_v2 = vpack.c.bf16 %v229_v0, %v228_v60 }
  0xdf   :  { %408 = vst [vmem:[%s546_s3 + $0x10] sm:$0xff] %v380_v1   ;;  %412 = vst [vmem:[%s546_s3 + $0x30] sm:$0xff] %v400_v2  }

// kernel: super_light_mobilenet_forward.5
= control target key start
LH: loop header
LB: loop body
LE: loop exit
PB: predicated region body
PF: predicated region fallthrough
CT: control target
= control target key end

     0   :  { %v55_v0 = vlaneseq  ;;  %s2097_s3 = inlined_call_operand.vmem [shape: bf16[128,128], index: 3, kind: input, shape index: {}]   ;;  %s2098_s0 = inlined_call_operand.vmem [shape: bf16[9,128,128], index: 0, kind: input, shape index: {}]   ;;  %s2099_s1 = inlined_call_operand.vmem [shape: f32[9,128], index: 1, kind: input, shape index: {}]   ;;  %s2100_s2 = inlined_call_operand.vmem [shape: f32[1,128], index: 2, kind: input, shape index: {}]   ;;  %s2101_s4 = inlined_call_operand.vmem [shape: f32[1,128], index: 4, kind: input, shape index: {}]   ;;  %s2102_s5 = inlined_call_operand.vmem [shape: bf16[128,128], index: 5, kind: output, shape index: {}]  }
   0x1   :  { %v1583_v1 = vld [vmem:[%s2097_s3 + $0x38] sm:$0xff]   ;;  %v1584_v2 = vld [vmem:[%s2097_s3 + $0x30] sm:$0xff]   ;;  %v1585_v4 = vld [vmem:[%s2097_s3 + $0x28] sm:$0xff]  }
   0x2   :  { %v1627_v3 = vshrl.u32 %v55_v0, 7  ;;  %1535 = vmatprep.subr.bf16.mxu0 %v1583_v1  ;;  %1567 = vmatprep.subr.bf16.mxu1 %v1583_v1  ;;  %v1586_v7 = vld [vmem:[%s2097_s3 + $0x20] sm:$0xff]   ;;  %v1587_v31 = vld [vmem:[%s2097_s3 + $0x18] sm:$0xff]   ;;  %v1588_v51 = vld [vmem:[%s2097_s3 + $0x10] sm:$0xff]  }
   0x3   :  { %1536 = vmatpush3.bf16.msra.mxu0 %v1583_v1  ;;  %1575 = vmatpush3.bf16.msra.mxu1 %v1583_v1  ;;  %v1641_v9 = vld [vmem:[%s2099_s1] sm:$0xff]  ;;  %v1716_v62 = vld [vmem:[%s2099_s1 + $0x8] ss:$0 sm:$0xff] }
   0x4   :  { %1537 = vmatprep.subr.bf16.mxu0 %v1584_v2  ;;  %1568 = vmatprep.subr.bf16.mxu1 %v1584_v2  ;;  %v57_v5 = vsub.s32 0, %v1627_v3  ;;  %v110_v6 = vsub.s32 1, %v1627_v3  ;;  %v179_v8 = vsub.s32 2, %v1627_v3  ;;  %v1114_v10 = vld [vmem:[%s2098_s0] sm:$0xff]   ;;  %v248_v11 = vsub.s32 3, %v1627_v3 }
   0x5   :  { %v317_v12 = vsub.s32 4, %v1627_v3  ;;  %v386_v13 = vsub.s32 5, %v1627_v3  ;;  %v455_v14 = vsub.s32 6, %v1627_v3  ;;  %v1115_v15 = vunpack.c.l.bf16 %v1114_v10  ;;  %v1448_v18 = vld [vmem:[%s2098_s0 + $0x40] sm:$0xff]  }
   0x6   :  { %v1116_v16 = vunpack.c.h.bf16 %v1114_v10  ;;  %v1651_v17 = vrot.slane %v1641_v9, %v57_v5  ;;  %v1657_v19 = vrot.slane %v1641_v9, %v110_v6  ;;  %v1456_v20 = vld [vmem:[%s2098_s0 + $0x80] sm:$0xff]   ;;  %v1147_v22 = vunpack.c.l.bf16 %v1448_v18 }
   0x7   :  { %1538 = vmatpush3.bf16.msra.mxu0 %v1584_v2  ;;  %1576 = vmatpush3.bf16.msra.mxu1 %v1584_v2  ;;  %v1464_v21 = vld [vmem:[%s2098_s0 + $0xc0] sm:$0xff]   ;;  %v1148_v23 = vunpack.c.h.bf16 %v1448_v18  ;;  %v1179_v24 = vunpack.c.l.bf16 %v1456_v20  ;;  %v1180_v25 = vunpack.c.h.bf16 %v1456_v20  ;;  %v1671_v29 = vrot.slane %v1641_v9, %v179_v8  ;;  %v1589_v8 = vld [vmem:[%s2097_s3 + $0x8] sm:$0xff]  }
   0x8   :  { %1539 = vmatprep.subr.bf16.mxu0 %v1585_v4  ;;  %1569 = vmatprep.subr.bf16.mxu1 %v1585_v4  ;;  %v1472_v26 = vld [vmem:[%s2098_s0 + $0x100] sm:$0xff]   ;;  %v59_v27 = vmul.f32 %v1115_v15, %v1651_v17  ;;  %v60_v28 = vmul.f32 %v1116_v16, %v1651_v17  ;;  %v1211_v30 = vunpack.c.l.bf16 %v1464_v21  ;;  %v112_v32 = vmul.f32 %v1147_v22, %v1657_v19 }
   0x9   :  { %v113_v33 = vmul.f32 %v1148_v23, %v1657_v19  ;;  %v1212_v34 = vunpack.c.h.bf16 %v1464_v21  ;;  %v1679_v35 = vrot.slane %v1641_v9, %v248_v11  ;;  %v1480_v36 = vld [vmem:[%s2098_s0 + $0x140] sm:$0xff]   ;;  %v181_v37 = vmul.f32 %v1179_v24, %v1671_v29 }
   0xa   :  { %v182_v38 = vmul.f32 %v1180_v25, %v1671_v29  ;;  %v1243_v39 = vunpack.c.l.bf16 %v1472_v26  ;;  %v1244_v40 = vunpack.c.h.bf16 %v1472_v26  ;;  %v1488_v41 = vld [vmem:[%s2098_s0 + $0x180] sm:$0xff]   ;;  %v128_v42 = vadd.f32 %v112_v32, %v59_v27 }
   0xb   :  { %1540 = vmatpush3.bf16.msra.mxu0 %v1585_v4  ;;  %1577 = vmatpush3.bf16.msra.mxu1 %v1585_v4  ;;  %v129_v43 = vadd.f32 %v113_v33, %v60_v28  ;;  %v250_v44 = vmul.f32 %v1211_v30, %v1679_v35  ;;  %v251_v45 = vmul.f32 %v1212_v34, %v1679_v35  ;;  %v1275_v47 = vunpack.c.l.bf16 %v1480_v36  ;;  %v1496_v50 = vld [vmem:[%s2098_s0 + $0x1c0] sm:$0xff]  }
   0xc   :  { %1541 = vmatprep.subr.bf16.mxu0 %v1586_v7  ;;  %1570 = vmatprep.subr.bf16.mxu1 %v1586_v7  ;;  %v1692_v46 = vrot.slane %v1641_v9, %v317_v12  ;;  %v1276_v48 = vunpack.c.h.bf16 %v1480_v36  ;;  %v1695_v49 = vrot.slane %v1641_v9, %v386_v13  ;;  %v197_v52 = vadd.f32 %v181_v37, %v128_v42  ;;  %v1504_v56 = vld [vmem:[%s2098_s0 + $0x200] sm:$0xff]  }
   0xd   :  { %v198_v53 = vadd.f32 %v182_v38, %v129_v43  ;;  %v1307_v54 = vunpack.c.l.bf16 %v1488_v41  ;;  %v1308_v55 = vunpack.c.h.bf16 %v1488_v41  ;;  %v1444_v61 = vld [vmem:[%s2098_s0 + $0x20] sm:$0xff]   ;;  %v1719_v1 = vrot.slane %v1641_v9, %v455_v14 }
   0xe   :  { %v319_v57 = vmul.f32 %v1243_v39, %v1692_v46  ;;  %v320_v58 = vmul.f32 %v1244_v40, %v1692_v46  ;;  %v388_v59 = vmul.f32 %v1275_v47, %v1695_v49  ;;  %v389_v60 = vmul.f32 %v1276_v48, %v1695_v49  ;;  %v1452_v14 = vld [vmem:[%s2098_s0 + $0x60] sm:$0xff]  }
   0xf   :  { %1542 = vmatpush3.bf16.msra.mxu0 %v1586_v7  ;;  %1578 = vmatpush3.bf16.msra.mxu1 %v1586_v7  ;;  %v266_v63 = vadd.f32 %v250_v44, %v197_v52  ;;  %v267_v0 = vadd.f32 %v251_v45, %v198_v53  ;;  %v1339_v2 = vunpack.c.l.bf16 %v1496_v50  ;;  %v1340_v4 = vunpack.c.h.bf16 %v1496_v50  ;;  %v1460_v20 = vld [vmem:[%s2098_s0 + $0xa0] sm:$0xff]  }
  0x10   :  { %1543 = vmatprep.subr.bf16.mxu0 %v1587_v31  ;;  %1571 = vmatprep.subr.bf16.mxu1 %v1587_v31  ;;  %v524_v5 = vsub.s32 7, %v1627_v3  ;;  %v1371_v6 = vunpack.c.l.bf16 %v1504_v56  ;;  %v1372_v7 = vunpack.c.h.bf16 %v1504_v56  ;;  %v457_v12 = vmul.f32 %v1307_v54, %v1719_v1  ;;  %v1468_v25 = vld [vmem:[%s2098_s0 + $0xe0] sm:$0xff]  }
  0x11   :  { %v335_v10 = vadd.f32 %v319_v57, %v266_v63  ;;  %v336_v11 = vadd.f32 %v320_v58, %v267_v0  ;;  %v1131_v13 = vunpack.c.l.bf16 %v1444_v61  ;;  %v458_v15 = vmul.f32 %v1308_v55, %v1719_v1  ;;  %v1590_v30 = vld [vmem:[%s2097_s3] sm:$0xff]  }
  0x12   :  { %v1731_v3 = vrot.slane %v1641_v9, %v524_v5  ;;  %v595_v16 = vmul.f32 %v1371_v6, %v1716_v62  ;;  %v596_v18 = vmul.f32 %v1372_v7, %v1716_v62  ;;  %v1132_v23 = vunpack.c.h.bf16 %v1444_v61  ;;  %v1476_v36 = vld [vmem:[%s2098_s0 + $0x120] sm:$0xff]  }
  0x13   :  { %1544 = vmatpush3.bf16.msra.mxu0 %v1587_v31  ;;  %1579 = vmatpush3.bf16.msra.mxu1 %v1587_v31  ;;  %v404_v21 = vadd.f32 %v388_v59, %v335_v10  ;;  %v405_v22 = vadd.f32 %v389_v60, %v336_v11  ;;  %v67_v24 = vmul.f32 %v1131_v13, %v1651_v17  ;;  %v1163_v27 = vunpack.c.l.bf16 %v1452_v14  ;;  %v1757_v45 = vld [vmem:[%s2100_s2] ss:$0 sm:$0xff] }
  0x14   :  { %1545 = vmatprep.subr.bf16.mxu0 %v1588_v51  ;;  %1572 = vmatprep.subr.bf16.mxu1 %v1588_v51  ;;  %v526_v9 = vmul.f32 %v1339_v2, %v1731_v3  ;;  %v527_v26 = vmul.f32 %v1340_v4, %v1731_v3  ;;  %v1164_v28 = vunpack.c.h.bf16 %v1452_v14  ;;  %v68_v33 = vmul.f32 %v1132_v23, %v1651_v17  ;;  %v1484_v52 = vld [vmem:[%s2098_s0 + $0x160] sm:$0xff]  }
  0x15   :  { %v473_v31 = vadd.f32 %v457_v12, %v404_v21  ;;  %v474_v32 = vadd.f32 %v458_v15, %v405_v22  ;;  %v1195_v34 = vunpack.c.l.bf16 %v1460_v20  ;;  %v120_v37 = vmul.f32 %v1163_v27, %v1657_v19  ;;  %v1492_v57 = vld [vmem:[%s2098_s0 + $0x1a0] sm:$0xff]   ;;  %v1441_v22 = vld [vmem:[%s2098_s0 + $0x8] sm:$0xff]  }
  0x16   :  { %v121_v38 = vmul.f32 %v1164_v28, %v1657_v19  ;;  %v1196_v39 = vunpack.c.h.bf16 %v1460_v20  ;;  %v1227_v40 = vunpack.c.l.bf16 %v1468_v25  ;;  %v1228_v44 = vunpack.c.h.bf16 %v1468_v25  ;;  %v1500_v10 = vld [vmem:[%s2098_s0 + $0x1e0] sm:$0xff]  }
  0x17   :  { %1546 = vmatpush3.bf16.msra.mxu0 %v1588_v51  ;;  %1580 = vmatpush3.bf16.msra.mxu1 %v1588_v51  ;;  %v542_v41 = vadd.f32 %v526_v9, %v473_v31  ;;  %v543_v42 = vadd.f32 %v527_v26, %v474_v32  ;;  %v189_v43 = vmul.f32 %v1195_v34, %v1671_v29  ;;  %v1259_v51 = vunpack.c.l.bf16 %v1476_v36  ;;  %v1508_v15 = vld [vmem:[%s2098_s0 + $0x220] sm:$0xff]   ;;  %v1449_v31 = vld [vmem:[%s2098_s0 + $0x48] sm:$0xff]  }
  0x18   :  { %1547 = vmatprep.subr.bf16.mxu0 %v1589_v8  ;;  %1573 = vmatprep.subr.bf16.mxu1 %v1589_v8  ;;  %v136_v47 = vadd.f32 %v120_v37, %v67_v24  ;;  %v137_v48 = vadd.f32 %v121_v38, %v68_v33  ;;  %v190_v50 = vmul.f32 %v1196_v39, %v1671_v29  ;;  %v1260_v56 = vunpack.c.h.bf16 %v1476_v36  ;;  %v1457_v37 = vld [vmem:[%s2098_s0 + $0x88] sm:$0xff]  }
  0x19   :  { %v611_v53 = vadd.f32 %v595_v16, %v542_v41  ;;  %v612_v54 = vadd.f32 %v596_v18, %v543_v42  ;;  %v258_v55 = vmul.f32 %v1227_v40, %v1679_v35  ;;  %v259_v60 = vmul.f32 %v1228_v44, %v1679_v35  ;;  %v1465_v42 = vld [vmem:[%s2098_s0 + $0xc8] sm:$0xff]  }
  0x1a   :  { %v205_v58 = vadd.f32 %v189_v43, %v136_v47  ;;  %v206_v59 = vadd.f32 %v190_v50, %v137_v48  ;;  %v327_v61 = vmul.f32 %v1259_v51, %v1692_v46  ;;  %v328_v2 = vmul.f32 %v1260_v56, %v1692_v46 }
  0x1b   :  { %1548 = vmatpush3.bf16.msra.mxu0 %v1589_v8  ;;  %1581 = vmatpush3.bf16.msra.mxu1 %v1589_v8  ;;  %v634_v63 = vadd.f32 %v1757_v45, %v611_v53  ;;  %v635_v0 = vadd.f32 %v1757_v45, %v612_v54  ;;  %v1291_v4 = vunpack.c.l.bf16 %v1484_v52  ;;  %v1292_v7 = vunpack.c.h.bf16 %v1484_v52 }
  0x1c   :  { %1549 = vmatprep.subr.bf16.mxu0 %v1590_v30  ;;  %1574 = vmatprep.subr.bf16.mxu1 %v1590_v30  ;;  %v274_v5 = vadd.f32 %v258_v55, %v205_v58  ;;  %v275_v6 = vadd.f32 %v259_v60, %v206_v59  ;;  %v1323_v8 = vunpack.c.l.bf16 %v1492_v57  ;;  %v1324_v14 = vunpack.c.h.bf16 %v1492_v57  ;;  %v1473_v58 = vld [vmem:[%s2098_s0 + $0x108] sm:$0xff]  }
  0x1d   :  { %v650_v11 = vmax.f32 %v634_v63, 0.0  ;;  %v651_v12 = vmax.f32 %v635_v0, 0.0  ;;  %v396_v13 = vmul.f32 %v1291_v4, %v1695_v49  ;;  %v397_v20 = vmul.f32 %v1292_v7, %v1695_v49  ;;  %v1481_v0 = vld [vmem:[%s2098_s0 + $0x148] sm:$0xff]  }
  0x1e   :  { %v343_v16 = vadd.f32 %v327_v61, %v274_v5  ;;  %v344_v18 = vadd.f32 %v328_v2, %v275_v6  ;;  %v465_v21 = vmul.f32 %v1323_v8, %v1719_v1  ;;  %v466_v24 = vmul.f32 %v1324_v14, %v1719_v1 }
  0x1f   :  { %1550 = vmatpush3.bf16.msra.mxu0 %v1590_v30  ;;  %1582 = vmatpush3.bf16.msra.mxu1 %v1590_v30  ;;  %v666_v23 = vpack.c.bf16 %v651_v12, %v650_v11  ;;  %v1355_v25 = vunpack.c.l.bf16 %v1500_v10  ;;  %v1356_v9 = vunpack.c.h.bf16 %v1500_v10  ;;  %v1387_v28 = vunpack.c.l.bf16 %v1508_v15 }
  0x20   :  { %v412_v26 = vadd.f32 %v396_v13, %v343_v16  ;;  %v413_v27 = vadd.f32 %v397_v20, %v344_v18  ;;  %v1388_v30 = vunpack.c.h.bf16 %v1508_v15  ;;  %v1119_v34 = vunpack.c.l.bf16 %v1441_v22  ;;  %v1489_v16 = vld [vmem:[%s2098_s0 + $0x188] sm:$0xff]  }
  0x21   :  { %1551 = vmatprep.mubr.bf16.mxu0 %v666_v23  ;;  %v534_v32 = vmul.f32 %v1355_v25, %v1731_v3  ;;  %v535_v33 = vmul.f32 %v1356_v9, %v1731_v3  ;;  %v1120_v36 = vunpack.c.h.bf16 %v1441_v22  ;;  %v603_v40 = vmul.f32 %v1387_v28, %v1716_v62  ;;  %v1497_v18 = vld [vmem:[%s2098_s0 + $0x1c8] sm:$0xff]  }
  0x22   :  { %v481_v38 = vadd.f32 %v465_v21, %v412_v26  ;;  %v482_v39 = vadd.f32 %v466_v24, %v413_v27  ;;  %v604_v41 = vmul.f32 %v1388_v30, %v1716_v62  ;;  %v61_v43 = vmul.f32 %v1119_v34, %v1651_v17  ;;  %v1505_v24 = vld [vmem:[%s2098_s0 + $0x208] sm:$0xff]  }
  0x23   :  { %v62_v44 = vmul.f32 %v1120_v36, %v1651_v17  ;;  %v1151_v47 = vunpack.c.l.bf16 %v1449_v31  ;;  %v1152_v48 = vunpack.c.h.bf16 %v1449_v31  ;;  %v1183_v52 = vunpack.c.l.bf16 %v1457_v37 }
  0x24   :  { %v550_v50 = vadd.f32 %v534_v32, %v481_v38  ;;  %v551_v51 = vadd.f32 %v535_v33, %v482_v39  ;;  %v1184_v53 = vunpack.c.h.bf16 %v1457_v37  ;;  %v1215_v56 = vunpack.c.l.bf16 %v1465_v42  ;;  %v1445_v38 = vld [vmem:[%s2098_s0 + $0x28] sm:$0xff]  }
  0x25   :  { %v114_v54 = vmul.f32 %v1151_v47, %v1657_v19  ;;  %v115_v55 = vmul.f32 %v1152_v48, %v1657_v19  ;;  %v1216_v57 = vunpack.c.h.bf16 %v1465_v42  ;;  %v183_v61 = vmul.f32 %v1183_v52, %v1671_v29  ;;  %v1453_v39 = vld [vmem:[%s2098_s0 + $0x68] sm:$0xff]  }
  0x26   :  { %v619_v59 = vadd.f32 %v603_v40, %v550_v50  ;;  %v620_v60 = vadd.f32 %v604_v41, %v551_v51  ;;  %v184_v63 = vmul.f32 %v1184_v53, %v1671_v29  ;;  %v252_v5 = vmul.f32 %v1215_v56, %v1679_v35 }
  0x27   :  { %v130_v2 = vadd.f32 %v114_v54, %v61_v43  ;;  %v131_v4 = vadd.f32 %v115_v55, %v62_v44  ;;  %v253_v6 = vmul.f32 %v1216_v57, %v1679_v35  ;;  %v1247_v10 = vunpack.c.l.bf16 %v1473_v58  ;;  %v1461_v44 = vld [vmem:[%s2098_s0 + $0xa8] sm:$0xff]  }
  0x28   :  { %v642_v7 = vadd.f32 %v1757_v45, %v619_v59  ;;  %v643_v8 = vadd.f32 %v1757_v45, %v620_v60  ;;  %v1248_v11 = vunpack.c.h.bf16 %v1473_v58  ;;  %v1279_v14 = vunpack.c.l.bf16 %v1481_v0  ;;  %v1469_v60 = vld [vmem:[%s2098_s0 + $0xe8] sm:$0xff]  }
  0x29   :  { %v199_v12 = vadd.f32 %v183_v61, %v130_v2  ;;  %v200_v13 = vadd.f32 %v184_v63, %v131_v4  ;;  %v1280_v15 = vunpack.c.h.bf16 %v1481_v0  ;;  %v321_v22 = vmul.f32 %v1247_v10, %v1692_v46  ;;  %v1477_v4 = vld [vmem:[%s2098_s0 + $0x128] sm:$0xff]  }
  0x2a   :  { %v658_v20 = vmax.f32 %v642_v7, 0.0  ;;  %v659_v21 = vmax.f32 %v643_v8, 0.0  ;;  %v322_v23 = vmul.f32 %v1248_v11, %v1692_v46  ;;  %v390_v26 = vmul.f32 %v1279_v14, %v1695_v49 }
  0x2b   :  { %v268_v25 = vadd.f32 %v252_v5, %v199_v12  ;;  %v269_v9 = vadd.f32 %v253_v6, %v200_v13  ;;  %v391_v27 = vmul.f32 %v1280_v15, %v1695_v49  ;;  %v1311_v30 = vunpack.c.l.bf16 %v1489_v16 }
  0x2c   :  { %v670_v28 = vpack.c.bf16 %v659_v21, %v658_v20  ;;  %v1312_v31 = vunpack.c.h.bf16 %v1489_v16  ;;  %v1343_v32 = vunpack.c.l.bf16 %v1497_v18  ;;  %v1344_v36 = vunpack.c.h.bf16 %v1497_v18  ;;  %v1485_v20 = vld [vmem:[%s2098_s0 + $0x168] sm:$0xff]  }
  0x2d   :  { %v337_v33 = vadd.f32 %v321_v22, %v268_v25  ;;  %v338_v34 = vadd.f32 %v322_v23, %v269_v9  ;;  %v1375_v37 = vunpack.c.l.bf16 %v1505_v24  ;;  %v459_v40 = vmul.f32 %v1311_v30, %v1719_v1  ;;  %v1493_v25 = vld [vmem:[%s2098_s0 + $0x1a8] sm:$0xff]  }
  0x2e   :  { %1559 = vmatprep.mubr.bf16.mxu1 %v670_v28  ;;  %v460_v41 = vmul.f32 %v1312_v31, %v1719_v1  ;;  %v528_v42 = vmul.f32 %v1343_v32, %v1731_v3  ;;  %v1376_v43 = vunpack.c.h.bf16 %v1505_v24  ;;  %v529_v50 = vmul.f32 %v1344_v36, %v1731_v3 }
  0x2f   :  { %v406_v47 = vadd.f32 %v390_v26, %v337_v33  ;;  %v407_v48 = vadd.f32 %v391_v27, %v338_v34  ;;  %v597_v51 = vmul.f32 %v1375_v37, %v1716_v62  ;;  %v1135_v53 = vunpack.c.l.bf16 %v1445_v38  ;;  %v1501_v34 = vld [vmem:[%s2098_s0 + $0x1e8] sm:$0xff]  }
  0x30   :  { %v598_v52 = vmul.f32 %v1376_v43, %v1716_v62  ;;  %v1136_v54 = vunpack.c.h.bf16 %v1445_v38  ;;  %v1167_v55 = vunpack.c.l.bf16 %v1453_v39  ;;  %v1168_v58 = vunpack.c.h.bf16 %v1453_v39 }
  0x31   :  { %v475_v56 = vadd.f32 %v459_v40, %v406_v47  ;;  %v476_v57 = vadd.f32 %v460_v41, %v407_v48  ;;  %v1199_v59 = vunpack.c.l.bf16 %v1461_v44  ;;  %v69_v61 = vmul.f32 %v1135_v53, %v1651_v17  ;;  %v1509_v40 = vld [vmem:[%s2098_s0 + $0x228] sm:$0xff]   ;;  %v1442_v47 = vld [vmem:[%s2098_s0 + $0x10] sm:$0xff]  }
  0x32   :  { %v70_v63 = vmul.f32 %v1136_v54, %v1651_v17  ;;  %v122_v0 = vmul.f32 %v1167_v55, %v1657_v19  ;;  %v1200_v2 = vunpack.c.h.bf16 %v1461_v44  ;;  %v123_v7 = vmul.f32 %v1168_v58, %v1657_v19 }
  0x33   :  { %v544_v5 = vadd.f32 %v528_v42, %v475_v56  ;;  %v545_v6 = vadd.f32 %v529_v50, %v476_v57  ;;  %v191_v8 = vmul.f32 %v1199_v59, %v1671_v29  ;;  %v1231_v12 = vunpack.c.l.bf16 %v1469_v60  ;;  %v1450_v57 = vld [vmem:[%s2098_s0 + $0x50] sm:$0xff]  }
  0x34   :  { %v138_v10 = vadd.f32 %v122_v0, %v69_v61  ;;  %v192_v11 = vmul.f32 %v1200_v2, %v1671_v29  ;;  %v1232_v13 = vunpack.c.h.bf16 %v1469_v60  ;;  %v139_v16 = vadd.f32 %v123_v7, %v70_v63  ;;  %v1458_v63 = vld [vmem:[%s2098_s0 + $0x90] sm:$0xff]  }
  0x35   :  { %v613_v14 = vadd.f32 %v597_v51, %v544_v5  ;;  %v614_v15 = vadd.f32 %v598_v52, %v545_v6  ;;  %v1263_v18 = vunpack.c.l.bf16 %v1477_v4  ;;  %v260_v22 = vmul.f32 %v1231_v12, %v1679_v35  ;;  %v1466_v6 = vld [vmem:[%s2098_s0 + $0xd0] sm:$0xff]  }
  0x36   :  { %v207_v21 = vadd.f32 %v191_v8, %v138_v10  ;;  %v261_v23 = vmul.f32 %v1232_v13, %v1679_v35  ;;  %v1264_v24 = vunpack.c.h.bf16 %v1477_v4  ;;  %v208_v27 = vadd.f32 %v192_v11, %v139_v16 }
  0x37   :  { %v636_v9 = vadd.f32 %v1757_v45, %v613_v14  ;;  %v637_v26 = vadd.f32 %v1757_v45, %v614_v15  ;;  %v329_v28 = vmul.f32 %v1263_v18, %v1692_v46  ;;  %v1295_v32 = vunpack.c.l.bf16 %v1485_v20 }
  0x38   :  { %v276_v30 = vadd.f32 %v260_v22, %v207_v21  ;;  %v330_v31 = vmul.f32 %v1264_v24, %v1692_v46  ;;  %v1296_v33 = vunpack.c.h.bf16 %v1485_v20  ;;  %v277_v38 = vadd.f32 %v261_v23, %v208_v27  ;;  %v1474_v22 = vld [vmem:[%s2098_s0 + $0x110] sm:$0xff]  }
  0x39   :  { %v652_v36 = vmax.f32 %v636_v9, 0.0  ;;  %v653_v37 = vmax.f32 %v637_v26, 0.0  ;;  %v1327_v39 = vunpack.c.l.bf16 %v1493_v25  ;;  %v398_v42 = vmul.f32 %v1295_v32, %v1695_v49  ;;  %v1482_v26 = vld [vmem:[%s2098_s0 + $0x150] sm:$0xff]  }
  0x3a   :  { %v345_v41 = vadd.f32 %v329_v28, %v276_v30  ;;  %v399_v43 = vmul.f32 %v1296_v33, %v1695_v49  ;;  %v1328_v44 = vunpack.c.h.bf16 %v1493_v25  ;;  %v346_v50 = vadd.f32 %v330_v31, %v277_v38 }
  0x3b   :  { %v667_v48 = vpack.c.bf16 %v653_v37, %v652_v36  ;;  %v467_v51 = vmul.f32 %v1327_v39, %v1719_v1  ;;  %v1359_v52 = vunpack.c.l.bf16 %v1501_v34  ;;  %v1360_v55 = vunpack.c.h.bf16 %v1501_v34 }
  0x3c   :  { %v414_v53 = vadd.f32 %v398_v42, %v345_v41  ;;  %v468_v54 = vmul.f32 %v1328_v44, %v1719_v1  ;;  %v1391_v56 = vunpack.c.l.bf16 %v1509_v40  ;;  %v415_v58 = vadd.f32 %v399_v43, %v346_v50  ;;  %v1490_v41 = vld [vmem:[%s2098_s0 + $0x190] sm:$0xff]  }
  0x3d   :  { %1552 = vmatmul.mubr.bf16.vlgmr.msra.gmra.mxu0 %v667_v48  ;;  %v536_v59 = vmul.f32 %v1359_v52, %v1731_v3  ;;  %v1392_v60 = vunpack.c.h.bf16 %v1509_v40  ;;  %v1123_v61 = vunpack.c.l.bf16 %v1442_v47  ;;  %v537_v2 = vmul.f32 %v1360_v55, %v1731_v3  ;;  %v1498_v48 = vld [vmem:[%s2098_s0 + $0x1d0] sm:$0xff]  }
  0x3e   :  { %v483_v0 = vadd.f32 %v467_v51, %v414_v53  ;;  %v605_v4 = vmul.f32 %v1391_v56, %v1716_v62  ;;  %v1124_v5 = vunpack.c.h.bf16 %v1442_v47  ;;  %v484_v7 = vadd.f32 %v468_v54, %v415_v58  ;;  %v1506_v54 = vld [vmem:[%s2098_s0 + $0x210] sm:$0xff]  }
  0x3f   :  { %v606_v8 = vmul.f32 %v1392_v60, %v1716_v62  ;;  %v63_v10 = vmul.f32 %v1123_v61, %v1651_v17  ;;  %v1155_v11 = vunpack.c.l.bf16 %v1450_v57  ;;  %v1156_v14 = vunpack.c.h.bf16 %v1450_v57 }
  0x40   :  { %v552_v12 = vadd.f32 %v536_v59, %v483_v0  ;;  %v64_v13 = vmul.f32 %v1124_v5, %v1651_v17  ;;  %v1187_v15 = vunpack.c.l.bf16 %v1458_v63  ;;  %v553_v16 = vadd.f32 %v537_v2, %v484_v7  ;;  %v1446_v0 = vld [vmem:[%s2098_s0 + $0x30] sm:$0xff]  }
  0x41   :  { %v116_v18 = vmul.f32 %v1155_v11, %v1657_v19  ;;  %v1188_v20 = vunpack.c.h.bf16 %v1458_v63  ;;  %v1219_v21 = vunpack.c.l.bf16 %v1466_v6  ;;  %v117_v24 = vmul.f32 %v1156_v14, %v1657_v19  ;;  %v1454_v7 = vld [vmem:[%s2098_s0 + $0x70] sm:$0xff]  }
  0x42   :  { %v621_v23 = vadd.f32 %v605_v4, %v552_v12  ;;  %v185_v25 = vmul.f32 %v1187_v15, %v1671_v29  ;;  %v1220_v9 = vunpack.c.h.bf16 %v1466_v6  ;;  %v622_v27 = vadd.f32 %v606_v8, %v553_v16 }
  0x43   :  { %v132_v28 = vadd.f32 %v116_v18, %v63_v10  ;;  %v186_v30 = vmul.f32 %v1188_v20, %v1671_v29  ;;  %v254_v31 = vmul.f32 %v1219_v21, %v1679_v35  ;;  %v133_v33 = vadd.f32 %v117_v24, %v64_v13  ;;  %v1462_v13 = vld [vmem:[%s2098_s0 + $0xb0] sm:$0xff]  }
  0x44   :  { %v644_v32 = vadd.f32 %v1757_v45, %v621_v23  ;;  %v255_v34 = vmul.f32 %v1220_v9, %v1679_v35  ;;  %v1251_v36 = vunpack.c.l.bf16 %v1474_v22  ;;  %v645_v37 = vadd.f32 %v1757_v45, %v622_v27  ;;  %v1470_v24 = vld [vmem:[%s2098_s0 + $0xf0] sm:$0xff]  }
  0x45   :  { %v201_v38 = vadd.f32 %v185_v25, %v132_v28  ;;  %v1252_v39 = vunpack.c.h.bf16 %v1474_v22  ;;  %v1283_v40 = vunpack.c.l.bf16 %v1482_v26  ;;  %v202_v43 = vadd.f32 %v186_v30, %v133_v33  ;;  %v1478_v33 = vld [vmem:[%s2098_s0 + $0x130] sm:$0xff]  }
  0x46   :  { %v660_v42 = vmax.f32 %v644_v32, 0.0  ;;  %v323_v44 = vmul.f32 %v1251_v36, %v1692_v46  ;;  %v1284_v47 = vunpack.c.h.bf16 %v1482_v26  ;;  %v661_v50 = vmax.f32 %v645_v37, 0.0 }
  0x47   :  { %v270_v51 = vadd.f32 %v254_v31, %v201_v38  ;;  %v324_v52 = vmul.f32 %v1252_v39, %v1692_v46  ;;  %v392_v53 = vmul.f32 %v1283_v40, %v1695_v49  ;;  %v271_v55 = vadd.f32 %v255_v34, %v202_v43  ;;  %v1486_v43 = vld [vmem:[%s2098_s0 + $0x170] sm:$0xff]  }
  0x48   :  { %v393_v56 = vmul.f32 %v1284_v47, %v1695_v49  ;;  %v1315_v57 = vunpack.c.l.bf16 %v1490_v41  ;;  %v1316_v58 = vunpack.c.h.bf16 %v1490_v41  ;;  %v671_v59 = vpack.c.bf16 %v661_v50, %v660_v42 }
  0x49   :  { %v339_v60 = vadd.f32 %v323_v44, %v270_v51  ;;  %v1347_v61 = vunpack.c.l.bf16 %v1498_v48  ;;  %v1348_v63 = vunpack.c.h.bf16 %v1498_v48  ;;  %v340_v2 = vadd.f32 %v324_v52, %v271_v55  ;;  %v1494_v55 = vld [vmem:[%s2098_s0 + $0x1b0] sm:$0xff]  }
  0x4a   :  { %v461_v4 = vmul.f32 %v1315_v57, %v1719_v1  ;;  %v462_v5 = vmul.f32 %v1316_v58, %v1719_v1  ;;  %v1379_v6 = vunpack.c.l.bf16 %v1506_v54  ;;  %1560 = vmatmul.mubr.bf16.vlgmr.msra.gmra.mxu1 %v671_v59  ;;  %v1380_v12 = vunpack.c.h.bf16 %v1506_v54 }
  0x4b   :  { %v408_v8 = vadd.f32 %v392_v53, %v339_v60  ;;  %v530_v10 = vmul.f32 %v1347_v61, %v1731_v3  ;;  %v531_v11 = vmul.f32 %v1348_v63, %v1731_v3  ;;  %v409_v14 = vadd.f32 %v393_v56, %v340_v2  ;;  %v1502_v60 = vld [vmem:[%s2098_s0 + $0x1f0] sm:$0xff]  }
  0x4c   :  { %v599_v15 = vmul.f32 %v1379_v6, %v1716_v62  ;;  %v1139_v16 = vunpack.c.l.bf16 %v1446_v0  ;;  %v1140_v18 = vunpack.c.h.bf16 %v1446_v0  ;;  %v600_v21 = vmul.f32 %v1380_v12, %v1716_v62 }
  0x4d   :  { %v477_v20 = vadd.f32 %v461_v4, %v408_v8  ;;  %v1171_v22 = vunpack.c.l.bf16 %v1454_v7  ;;  %v1172_v23 = vunpack.c.h.bf16 %v1454_v7  ;;  %v478_v25 = vadd.f32 %v462_v5, %v409_v14  ;;  %v1510_v4 = vld [vmem:[%s2098_s0 + $0x230] sm:$0xff]   ;;  %v1443_v14 = vld [vmem:[%s2098_s0 + $0x18] sm:$0xff]  }
  0x4e   :  { %v71_v9 = vmul.f32 %v1139_v16, %v1651_v17  ;;  %v72_v26 = vmul.f32 %v1140_v18, %v1651_v17  ;;  %v1203_v27 = vunpack.c.l.bf16 %v1462_v13  ;;  %v1204_v32 = vunpack.c.h.bf16 %v1462_v13 }
  0x4f   :  { %v546_v28 = vadd.f32 %v530_v10, %v477_v20  ;;  %v124_v30 = vmul.f32 %v1171_v22, %v1657_v19  ;;  %v125_v31 = vmul.f32 %v1172_v23, %v1657_v19  ;;  %v547_v34 = vadd.f32 %v531_v11, %v478_v25 }
  0x50   :  { %v193_v36 = vmul.f32 %v1203_v27, %v1671_v29  ;;  %v1235_v37 = vunpack.c.l.bf16 %v1470_v24  ;;  %v1236_v38 = vunpack.c.h.bf16 %v1470_v24  ;;  %v194_v42 = vmul.f32 %v1204_v32, %v1671_v29 }
  0x51   :  { %v615_v39 = vadd.f32 %v599_v15, %v546_v28  ;;  %v140_v40 = vadd.f32 %v124_v30, %v71_v9  ;;  %v141_v41 = vadd.f32 %v125_v31, %v72_v26  ;;  %v616_v44 = vadd.f32 %v600_v21, %v547_v34  ;;  %v1451_v21 = vld [vmem:[%s2098_s0 + $0x58] sm:$0xff]  }
  0x52   :  { %v262_v47 = vmul.f32 %v1235_v37, %v1679_v35  ;;  %v263_v48 = vmul.f32 %v1236_v38, %v1679_v35  ;;  %v1267_v50 = vunpack.c.l.bf16 %v1478_v33  ;;  %v1268_v54 = vunpack.c.h.bf16 %v1478_v33  ;;  %v1459_v9 = vld [vmem:[%s2098_s0 + $0x98] sm:$0xff]  }
  0x53   :  { %v638_v51 = vadd.f32 %v1757_v45, %v615_v39  ;;  %v209_v52 = vadd.f32 %v193_v36, %v140_v40  ;;  %v210_v53 = vadd.f32 %v194_v42, %v141_v41  ;;  %v639_v56 = vadd.f32 %v1757_v45, %v616_v44  ;;  %v1467_v36 = vld [vmem:[%s2098_s0 + $0xd8] sm:$0xff]  }
  0x54   :  { %v331_v57 = vmul.f32 %v1267_v50, %v1692_v46  ;;  %v1299_v58 = vunpack.c.l.bf16 %v1486_v43  ;;  %v1300_v59 = vunpack.c.h.bf16 %v1486_v43  ;;  %v332_v2 = vmul.f32 %v1268_v54, %v1692_v46 }
  0x55   :  { %v654_v61 = vmax.f32 %v638_v51, 0.0  ;;  %v278_v63 = vadd.f32 %v262_v47, %v209_v52  ;;  %v279_v0 = vadd.f32 %v263_v48, %v210_v53  ;;  %v655_v5 = vmax.f32 %v639_v56, 0.0  ;;  %v1475_v47 = vld [vmem:[%s2098_s0 + $0x118] sm:$0xff]  }
  0x56   :  { %v400_v6 = vmul.f32 %v1299_v58, %v1695_v49  ;;  %v401_v7 = vmul.f32 %v1300_v59, %v1695_v49  ;;  %v1331_v8 = vunpack.c.l.bf16 %v1494_v55  ;;  %v1332_v12 = vunpack.c.h.bf16 %v1494_v55 }
  0x57   :  { %v347_v10 = vadd.f32 %v331_v57, %v278_v63  ;;  %v348_v11 = vadd.f32 %v332_v2, %v279_v0  ;;  %v1363_v13 = vunpack.c.l.bf16 %v1502_v60  ;;  %v668_v15 = vpack.c.bf16 %v655_v5, %v654_v61  ;;  %v1483_v57 = vld [vmem:[%s2098_s0 + $0x158] sm:$0xff]  }
  0x58   :  { %v469_v16 = vmul.f32 %v1331_v8, %v1719_v1  ;;  %v1364_v18 = vunpack.c.h.bf16 %v1502_v60  ;;  %v1395_v20 = vunpack.c.l.bf16 %v1510_v4  ;;  %v470_v24 = vmul.f32 %v1332_v12, %v1719_v1  ;;  %v1491_v5 = vld [vmem:[%s2098_s0 + $0x198] sm:$0xff]  }
  0x59   :  { %v416_v22 = vadd.f32 %v400_v6, %v347_v10  ;;  %v417_v23 = vadd.f32 %v401_v7, %v348_v11  ;;  %v538_v25 = vmul.f32 %v1363_v13, %v1731_v3  ;;  %1555 = vmatprep.mubr.bf16.mxu0 %v668_v15  ;;  %v1396_v27 = vunpack.c.h.bf16 %v1510_v4  ;;  %v1499_v15 = vld [vmem:[%s2098_s0 + $0x1d8] sm:$0xff]  }
  0x5a   :  { %v539_v26 = vmul.f32 %v1364_v18, %v1731_v3  ;;  %v607_v28 = vmul.f32 %v1395_v20, %v1716_v62  ;;  %v1127_v30 = vunpack.c.l.bf16 %v1443_v14  ;;  %v1128_v33 = vunpack.c.h.bf16 %v1443_v14 }
  0x5b   :  { %v485_v31 = vadd.f32 %v469_v16, %v416_v22  ;;  %v486_v32 = vadd.f32 %v470_v24, %v417_v23  ;;  %v1159_v34 = vunpack.c.l.bf16 %v1451_v21  ;;  %v608_v37 = vmul.f32 %v1396_v27, %v1716_v62  ;;  %v1507_v22 = vld [vmem:[%s2098_s0 + $0x218] sm:$0xff]  }
  0x5c   :  { %v65_v38 = vmul.f32 %v1127_v30, %v1651_v17  ;;  %v1160_v39 = vunpack.c.h.bf16 %v1451_v21  ;;  %v1191_v40 = vunpack.c.l.bf16 %v1459_v9  ;;  %v66_v43 = vmul.f32 %v1128_v33, %v1651_v17 }
  0x5d   :  { %v554_v41 = vadd.f32 %v538_v25, %v485_v31  ;;  %v555_v42 = vadd.f32 %v539_v26, %v486_v32  ;;  %v118_v44 = vmul.f32 %v1159_v34, %v1657_v19  ;;  %v1192_v50 = vunpack.c.h.bf16 %v1459_v9  ;;  %v1447_v26 = vld [vmem:[%s2098_s0 + $0x38] sm:$0xff]  }
  0x5e   :  { %v119_v48 = vmul.f32 %v1160_v39, %v1657_v19  ;;  %v187_v51 = vmul.f32 %v1191_v40, %v1671_v29  ;;  %v1223_v52 = vunpack.c.l.bf16 %v1467_v36  ;;  %v1224_v56 = vunpack.c.h.bf16 %v1467_v36 }
  0x5f   :  { %v623_v53 = vadd.f32 %v607_v28, %v554_v41  ;;  %v624_v54 = vadd.f32 %v608_v37, %v555_v42  ;;  %v134_v55 = vadd.f32 %v118_v44, %v65_v38  ;;  %v188_v59 = vmul.f32 %v1192_v50, %v1671_v29  ;;  %v1455_v37 = vld [vmem:[%s2098_s0 + $0x78] sm:$0xff]  }
  0x60   :  { %v135_v58 = vadd.f32 %v119_v48, %v66_v43  ;;  %v256_v60 = vmul.f32 %v1223_v52, %v1679_v35  ;;  %v1255_v61 = vunpack.c.l.bf16 %v1475_v47  ;;  %v257_v4 = vmul.f32 %v1224_v56, %v1679_v35  ;;  %v1463_v42 = vld [vmem:[%s2098_s0 + $0xb8] sm:$0xff]  }
  0x61   :  { %v646_v63 = vadd.f32 %v1757_v45, %v623_v53  ;;  %v647_v0 = vadd.f32 %v1757_v45, %v624_v54  ;;  %v203_v2 = vadd.f32 %v187_v51, %v134_v55  ;;  %v1256_v7 = vunpack.c.h.bf16 %v1475_v47  ;;  %v1471_v50 = vld [vmem:[%s2098_s0 + $0xf8] sm:$0xff]  }
  0x62   :  { %v204_v6 = vadd.f32 %v188_v59, %v135_v58  ;;  %v325_v8 = vmul.f32 %v1255_v61, %v1692_v46  ;;  %v1287_v10 = vunpack.c.l.bf16 %v1483_v57  ;;  %v1288_v14 = vunpack.c.h.bf16 %v1483_v57 }
  0x63   :  { %v662_v11 = vmax.f32 %v646_v63, 0.0  ;;  %v663_v12 = vmax.f32 %v647_v0, 0.0  ;;  %v272_v13 = vadd.f32 %v256_v60, %v203_v2  ;;  %v326_v18 = vmul.f32 %v1256_v7, %v1692_v46  ;;  %v1479_v0 = vld [vmem:[%s2098_s0 + $0x138] sm:$0xff]  }
  0x64   :  { %v273_v16 = vadd.f32 %v257_v4, %v204_v6  ;;  %v394_v20 = vmul.f32 %v1287_v10, %v1695_v49  ;;  %v1319_v21 = vunpack.c.l.bf16 %v1491_v5  ;;  %v395_v25 = vmul.f32 %v1288_v14, %v1695_v49 }
  0x65   :  { %v672_v23 = vpack.c.bf16 %v663_v12, %v662_v11  ;;  %v341_v24 = vadd.f32 %v325_v8, %v272_v13  ;;  %v1320_v9 = vunpack.c.h.bf16 %v1491_v5  ;;  %v1351_v30 = vunpack.c.l.bf16 %v1499_v15 }
  0x66   :  { %v342_v27 = vadd.f32 %v326_v18, %v273_v16  ;;  %v463_v28 = vmul.f32 %v1319_v21, %v1719_v1  ;;  %v1352_v31 = vunpack.c.h.bf16 %v1499_v15  ;;  %v1383_v34 = vunpack.c.l.bf16 %v1507_v22  ;;  %v1503_v21 = vld [vmem:[%s2098_s0 + $0x1f8] sm:$0xff]  }
  0x67   :  { %1563 = vmatprep.mubr.bf16.mxu1 %v672_v23  ;;  %v410_v32 = vadd.f32 %v394_v20, %v341_v24  ;;  %v464_v33 = vmul.f32 %v1320_v9, %v1719_v1  ;;  %v1384_v36 = vunpack.c.h.bf16 %v1507_v22  ;;  %v532_v39 = vmul.f32 %v1351_v30, %v1731_v3  ;;  %v1495_v20 = vld [vmem:[%s2098_s0 + $0x1b8] sm:$0xff]  }
  0x68   :  { %v411_v38 = vadd.f32 %v395_v25, %v342_v27  ;;  %v533_v40 = vmul.f32 %v1352_v31, %v1731_v3  ;;  %v1143_v41 = vunpack.c.l.bf16 %v1447_v26  ;;  %v601_v44 = vmul.f32 %v1383_v34, %v1716_v62 }
  0x69   :  { %v479_v43 = vadd.f32 %v463_v28, %v410_v32  ;;  %v602_v47 = vmul.f32 %v1384_v36, %v1716_v62  ;;  %v1144_v48 = vunpack.c.h.bf16 %v1447_v26  ;;  %v1175_v53 = vunpack.c.l.bf16 %v1455_v37  ;;  %v1511_v28 = vld [vmem:[%s2098_s0 + $0x238] sm:$0xff]  }
  0x6a   :  { %v480_v51 = vadd.f32 %v464_v33, %v411_v38  ;;  %v73_v52 = vmul.f32 %v1143_v41, %v1651_v17  ;;  %v1176_v54 = vunpack.c.h.bf16 %v1455_v37  ;;  %v1207_v57 = vunpack.c.l.bf16 %v1463_v42 }
  0x6b   :  { %v548_v55 = vadd.f32 %v532_v39, %v479_v43  ;;  %v74_v56 = vmul.f32 %v1144_v48, %v1651_v17  ;;  %v1208_v58 = vunpack.c.h.bf16 %v1463_v42  ;;  %v126_v60 = vmul.f32 %v1175_v53, %v1657_v19  ;;  %v1487_v17 = vld [vmem:[%s2098_s0 + $0x178] sm:$0xff]  }
  0x6c   :  { %v549_v59 = vadd.f32 %v533_v40, %v480_v51  ;;  %v127_v61 = vmul.f32 %v1176_v54, %v1657_v19  ;;  %v1239_v63 = vunpack.c.l.bf16 %v1471_v50  ;;  %v195_v4 = vmul.f32 %v1207_v57, %v1671_v29 }
  0x6d   :  { %v617_v2 = vadd.f32 %v601_v44, %v548_v55  ;;  %v196_v5 = vmul.f32 %v1208_v58, %v1671_v29  ;;  %v1240_v6 = vunpack.c.h.bf16 %v1471_v50  ;;  %v142_v8 = vadd.f32 %v126_v60, %v73_v52  ;;  %v1072_v60 = vld [vmem:[%s2101_s4] ss:$0 sm:$0xff] }
  0x6e   :  { %v618_v7 = vadd.f32 %v602_v47, %v549_v59  ;;  %v143_v10 = vadd.f32 %v127_v61, %v74_v56  ;;  %v264_v19 = vmul.f32 %v1239_v63, %v1679_v35  ;;  %v1271_v13 = vunpack.c.l.bf16 %v1479_v0 }
  0x6f   :  { %v640_v11 = vadd.f32 %v1757_v45, %v617_v2  ;;  %v265_v12 = vmul.f32 %v1240_v6, %v1679_v35  ;;  %v1272_v14 = vunpack.c.h.bf16 %v1479_v0  ;;  %v211_v16 = vadd.f32 %v195_v4, %v142_v8 }
  0x70   :  { %v641_v15 = vadd.f32 %v1757_v45, %v618_v7  ;;  %v212_v29 = vadd.f32 %v196_v5, %v143_v10  ;;  %v1303_v18 = vunpack.c.l.bf16 %v1487_v17  ;;  %v333_v23 = vmul.f32 %v1271_v13, %v1692_v46 }
  0x71   :  { %v656_v22 = vmax.f32 %v640_v11, 0.0  ;;  %v334_v35 = vmul.f32 %v1272_v14, %v1692_v46  ;;  %v1304_v24 = vunpack.c.h.bf16 %v1487_v17  ;;  %v280_v9 = vadd.f32 %v264_v19, %v211_v16 }
  0x72   :  { %v657_v25 = vmax.f32 %v641_v15, 0.0  ;;  %v281_v26 = vadd.f32 %v265_v12, %v212_v29  ;;  %v402_v27 = vmul.f32 %v1303_v18, %v1695_v49  ;;  %v1335_v31 = vunpack.c.l.bf16 %v1495_v20 }
  0x73   :  { %v403_v30 = vmul.f32 %v1304_v24, %v1695_v49  ;;  %v1336_v32 = vunpack.c.h.bf16 %v1495_v20  ;;  %v1367_v33 = vunpack.c.l.bf16 %v1503_v21  ;;  %v349_v36 = vadd.f32 %v333_v23, %v280_v9 }
  0x74   :  { %v669_v34 = vpack.c.bf16 %v657_v25, %v656_v22  ;;  %v350_v37 = vadd.f32 %v334_v35, %v281_v26  ;;  %v1368_v38 = vunpack.c.h.bf16 %v1503_v21  ;;  %v471_v46 = vmul.f32 %v1335_v31, %v1719_v1 }
  0x75   :  { %v472_v39 = vmul.f32 %v1336_v32, %v1719_v1  ;;  %v540_v40 = vmul.f32 %v1367_v33, %v1731_v3  ;;  %v1399_v41 = vunpack.c.l.bf16 %v1511_v28  ;;  %v418_v42 = vadd.f32 %v402_v27, %v349_v36 }
  0x76   :  { %1556 = vmatmul.mubr.bf16.gmra.mxu0 %v669_v34  ;;  %v419_v43 = vadd.f32 %v403_v30, %v350_v37  ;;  %v541_v44 = vmul.f32 %v1368_v38, %v1731_v3  ;;  %v1400_v49 = vunpack.c.h.bf16 %v1511_v28 }
  0x77   :  { %v487_v47 = vadd.f32 %v471_v46, %v418_v42  ;;  %v609_v50 = vmul.f32 %v1399_v41, %v1716_v62 }
  0x78   :  { %v488_v48 = vadd.f32 %v472_v39, %v419_v43  ;;  %v610_v51 = vmul.f32 %v1400_v49, %v1716_v62 }
  0x79   :  { %v556_v52 = vadd.f32 %v540_v40, %v487_v47 }
  0x7a   :  { %v557_v53 = vadd.f32 %v541_v44, %v488_v48 }
  0x7b   :  { %v625_v54 = vadd.f32 %v609_v50, %v556_v52 }
  0x7c   :  { %v626_v55 = vadd.f32 %v610_v51, %v557_v53 }
  0x7d   :  { %v648_v1 = vadd.f32 %v1757_v45, %v625_v54 }
  0x7e   :  { %v649_v56 = vadd.f32 %v1757_v45, %v626_v55 }
  0x7f   :  { %v664_v57 = vmax.f32 %v648_v1, 0.0 }
  0x80   :  { %v665_v58 = vmax.f32 %v649_v56, 0.0 }
  0x82   :  { %v673_v59 = vpack.c.bf16 %v665_v58, %v664_v57 }
  0x84   :  { %1564 = vmatmul.mubr.bf16.gmra.mxu1 %v673_v59 }
  0xfd   :  { %v1553_v3 = vpop.f32.mrf.mxu0 }
  0xfe   :  { %v788_v63 = vadd.f32 %v1553_v3, %v1072_v60 }
  0xff   :  { %v779_v61 = vpop.f32.mrf.mxu0 }
 0x100   :  { %v780_v0 = vadd.f32 %v1072_v60, %v779_v61  ;;  %v844_v5 = vmax.f32 %v788_v63, 0.0 }
 0x101   :  { %v1554_v62 = vpop.f32.mrf.mxu0 }
 0x102   :  { %v791_v2 = vadd.f32 %v1554_v62, %v1072_v60  ;;  %v842_v7 = vmax.f32 %v780_v0, 0.0 }
 0x103   :  { %v782_v4 = vpop.f32.mrf.mxu0 }
 0x104   :  { %v845_v6 = vmax.f32 %v791_v2, 0.0  ;;  %v783_v17 = vadd.f32 %v1072_v60, %v782_v4 }
 0x106   :  { %v1409_v45 = vpack.c.bf16 %v845_v6, %v844_v5  ;;  %v843_v8 = vmax.f32 %v783_v17, 0.0 }
 0x108   :  { %1512 = vst [vmem:[%s2102_s5 + $0x8] sm:$0xff] %v1409_v45   ;;  %v1404_v10 = vpack.c.bf16 %v843_v8, %v842_v7 }
 0x10a   :  { %1405 = vst [vmem:[%s2102_s5] sm:$0xff] %v1404_v10   ;;  %v1561_v19 = vpop.f32.mrf.mxu1 }
 0x10b   :  { %v820_v12 = vadd.f32 %v1561_v19, %v1072_v60 }
 0x10c   :  { %v811_v11 = vpop.f32.mrf.mxu1 }
 0x10d   :  { %v812_v14 = vadd.f32 %v1072_v60, %v811_v11  ;;  %v852_v29 = vmax.f32 %v820_v12, 0.0 }
 0x10e   :  { %v1562_v13 = vpop.f32.mrf.mxu1 }
 0x10f   :  { %v823_v15 = vadd.f32 %v1562_v13, %v1072_v60  ;;  %v850_v21 = vmax.f32 %v812_v14, 0.0 }
 0x110   :  { %v814_v16 = vpop.f32.mrf.mxu1 }
 0x111   :  { %v853_v18 = vmax.f32 %v823_v15, 0.0  ;;  %v815_v20 = vadd.f32 %v1072_v60, %v814_v16 }
 0x113   :  { %v1429_v22 = vpack.c.bf16 %v853_v18, %v852_v29  ;;  %v851_v23 = vmax.f32 %v815_v20, 0.0 }
 0x115   :  { %1516 = vst [vmem:[%s2102_s5 + $0x28] sm:$0xff] %v1429_v22   ;;  %v1424_v35 = vpack.c.bf16 %v851_v23, %v850_v21 }
 0x117   :  { %1515 = vst [vmem:[%s2102_s5 + $0x20] sm:$0xff] %v1424_v35  }
 0x136   :  { %v1557_v24 = vpop.f32.mrf.mxu0 }
 0x137   :  { %v804_v9 = vadd.f32 %v1557_v24, %v1072_v60 }
 0x138   :  { %v795_v25 = vpop.f32.mrf.mxu0 }
 0x139   :  { %v796_v27 = vadd.f32 %v1072_v60, %v795_v25  ;;  %v848_v31 = vmax.f32 %v804_v9, 0.0 }
 0x13a   :  { %v1558_v26 = vpop.f32.mrf.mxu0 }
 0x13b   :  { %v807_v28 = vadd.f32 %v1558_v26, %v1072_v60  ;;  %v846_v34 = vmax.f32 %v796_v27, 0.0 }
 0x13c   :  { %v798_v30 = vpop.f32.mrf.mxu0 }
 0x13d   :  { %v849_v32 = vmax.f32 %v807_v28, 0.0  ;;  %v799_v33 = vadd.f32 %v1072_v60, %v798_v30 }
 0x13f   :  { %v1419_v36 = vpack.c.bf16 %v849_v32, %v848_v31  ;;  %v847_v37 = vmax.f32 %v799_v33, 0.0 }
 0x141   :  { %1514 = vst [vmem:[%s2102_s5 + $0x18] sm:$0xff] %v1419_v36   ;;  %v1414_v38 = vpack.c.bf16 %v847_v37, %v846_v34 }
 0x143   :  { %1513 = vst [vmem:[%s2102_s5 + $0x10] sm:$0xff] %v1414_v38  }
 0x144   :  { %v1565_v46 = vpop.f32.mrf.mxu1 }
 0x145   :  { %v836_v40 = vadd.f32 %v1565_v46, %v1072_v60 }
 0x146   :  { %v827_v39 = vpop.f32.mrf.mxu1 }
 0x147   :  { %v828_v42 = vadd.f32 %v1072_v60, %v827_v39  ;;  %v856_v49 = vmax.f32 %v836_v40, 0.0 }
 0x148   :  { %v1566_v41 = vpop.f32.mrf.mxu1 }
 0x149   :  { %v839_v43 = vadd.f32 %v1566_v41, %v1072_v60  ;;  %v854_v50 = vmax.f32 %v828_v42, 0.0 }
 0x14a   :  { %v830_v44 = vpop.f32.mrf.mxu1 }
 0x14b   :  { %v857_v47 = vmax.f32 %v839_v43, 0.0  ;;  %v831_v48 = vadd.f32 %v1072_v60, %v830_v44 }
 0x14d   :  { %v1439_v51 = vpack.c.bf16 %v857_v47, %v856_v49  ;;  %v855_v52 = vmax.f32 %v831_v48, 0.0 }
 0x14f   :  { %1518 = vst [vmem:[%s2102_s5 + $0x38] sm:$0xff] %v1439_v51   ;;  %v1434_v53 = vpack.c.bf16 %v855_v52, %v854_v50 }
 0x151   :  { %1517 = vst [vmem:[%s2102_s5 + $0x30] sm:$0xff] %v1434_v53  }

// kernel: super_light_mobilenet_forward.6
= control target key start
LH: loop header
LB: loop body
LE: loop exit
PB: predicated region body
PF: predicated region fallthrough
CT: control target
= control target key end

     0   :  { %v31_v0 = vlaneseq  ;;  %s761_s3 = inlined_call_operand.vmem [shape: bf16[128,128], index: 3, kind: input, shape index: {}]   ;;  %s762_s0 = inlined_call_operand.vmem [shape: bf16[9,32,128], index: 0, kind: input, shape index: {}]   ;;  %s763_s1 = inlined_call_operand.vmem [shape: f32[9,128], index: 1, kind: input, shape index: {}]   ;;  %s764_s2 = inlined_call_operand.vmem [shape: f32[1,128], index: 2, kind: input, shape index: {}]   ;;  %s765_s4 = inlined_call_operand.vmem [shape: f32[1,128], index: 4, kind: input, shape index: {}]   ;;  %s766_s5 = inlined_call_operand.vmem [shape: bf16[32,128], index: 5, kind: output, shape index: {}]  }
   0x1   :  { %v553_v1 = vld [vmem:[%s761_s3 + $0x38] sm:$0xff]   ;;  %v554_v2 = vld [vmem:[%s761_s3 + $0x30] sm:$0xff]   ;;  %v555_v4 = vld [vmem:[%s761_s3 + $0x28] sm:$0xff]  }
   0x2   :  { %v597_v3 = vshrl.u32 %v31_v0, 7  ;;  %533 = vmatprep.subr.bf16.mxu0 %v553_v1  ;;  %v556_v7 = vld [vmem:[%s761_s3 + $0x20] sm:$0xff]   ;;  %v506_v18 = vld [vmem:[%s762_s0 + $0x10] sm:$0xff]   ;;  %v557_v31 = vld [vmem:[%s761_s3 + $0x18] sm:$0xff]  }
   0x3   :  { %534 = vmatpush3.bf16.msra.mxu0 %v553_v1  ;;  %v611_v9 = vld [vmem:[%s763_s1] sm:$0xff]  ;;  %v510_v21 = vld [vmem:[%s762_s0 + $0x30] sm:$0xff]   ;;  %v433_v22 = vunpack.c.l.bf16 %v506_v18  ;;  %v434_v23 = vunpack.c.h.bf16 %v506_v18  ;;  %v683_v61 = vld [vmem:[%s763_s1 + $0x8] ss:$0 sm:$0xff] }
   0x4   :  { %535 = vmatprep.subr.bf16.mxu0 %v554_v2  ;;  %v33_v5 = vsub.s32 0, %v597_v3  ;;  %v50_v6 = vsub.s32 1, %v597_v3  ;;  %v71_v8 = vsub.s32 2, %v597_v3  ;;  %v424_v10 = vld [vmem:[%s762_s0] sm:$0xff]   ;;  %v92_v11 = vsub.s32 3, %v597_v3  ;;  %v514_v36 = vld [vmem:[%s762_s0 + $0x50] sm:$0xff]  }
   0x5   :  { %v113_v12 = vsub.s32 4, %v597_v3  ;;  %v134_v13 = vsub.s32 5, %v597_v3  ;;  %v155_v14 = vsub.s32 6, %v597_v3  ;;  %v425_v15 = vunpack.c.l.bf16 %v424_v10  ;;  %v508_v20 = vld [vmem:[%s762_s0 + $0x20] sm:$0xff]   ;;  %v518_v50 = vld [vmem:[%s762_s0 + $0x70] sm:$0xff]  }
   0x6   :  { %v426_v16 = vunpack.c.h.bf16 %v424_v10  ;;  %v621_v17 = vrot.slane %v611_v9, %v33_v5  ;;  %v627_v19 = vrot.slane %v611_v9, %v50_v6  ;;  %v441_v24 = vunpack.c.l.bf16 %v508_v20  ;;  %v512_v26 = vld [vmem:[%s762_s0 + $0x40] sm:$0xff]   ;;  %v558_v51 = vld [vmem:[%s761_s3 + $0x10] sm:$0xff]   ;;  %v559_v10 = vld [vmem:[%s761_s3 + $0x8] sm:$0xff]  }
   0x7   :  { %536 = vmatpush3.bf16.msra.mxu0 %v554_v2  ;;  %v442_v25 = vunpack.c.h.bf16 %v508_v20  ;;  %v641_v29 = vrot.slane %v611_v9, %v71_v8  ;;  %v449_v30 = vunpack.c.l.bf16 %v510_v21  ;;  %v450_v34 = vunpack.c.h.bf16 %v510_v21  ;;  %v516_v41 = vld [vmem:[%s762_s0 + $0x60] sm:$0xff]   ;;  %v505_v2 = vld [vmem:[%s762_s0 + $0x8] sm:$0xff]   ;;  %v507_v8 = vld [vmem:[%s762_s0 + $0x18] sm:$0xff]  }
   0x8   :  { %537 = vmatprep.subr.bf16.mxu0 %v555_v4  ;;  %v35_v27 = vmul.f32 %v425_v15, %v621_v17  ;;  %v36_v28 = vmul.f32 %v426_v16, %v621_v17  ;;  %v52_v32 = vmul.f32 %v433_v22, %v627_v19  ;;  %v53_v33 = vmul.f32 %v434_v23, %v627_v19  ;;  %v520_v56 = vld [vmem:[%s762_s0 + $0x80] sm:$0xff]  }
   0x9   :  { %v649_v35 = vrot.slane %v611_v9, %v92_v11  ;;  %v73_v37 = vmul.f32 %v441_v24, %v641_v29  ;;  %v74_v38 = vmul.f32 %v442_v25, %v641_v29  ;;  %v457_v39 = vunpack.c.l.bf16 %v512_v26  ;;  %v509_v24 = vld [vmem:[%s762_s0 + $0x28] sm:$0xff]   ;;  %v511_v25 = vld [vmem:[%s762_s0 + $0x38] sm:$0xff]  }
   0xa   :  { %v458_v40 = vunpack.c.h.bf16 %v512_v26  ;;  %v56_v42 = vadd.f32 %v52_v32, %v35_v27  ;;  %v57_v43 = vadd.f32 %v53_v33, %v36_v28  ;;  %v662_v46 = vrot.slane %v611_v9, %v113_v12 }
   0xb   :  { %538 = vmatpush3.bf16.msra.mxu0 %v555_v4  ;;  %v94_v44 = vmul.f32 %v449_v30, %v649_v35  ;;  %v95_v45 = vmul.f32 %v450_v34, %v649_v35  ;;  %v465_v47 = vunpack.c.l.bf16 %v514_v36  ;;  %v466_v48 = vunpack.c.h.bf16 %v514_v36  ;;  %v560_v30 = vld [vmem:[%s761_s3] sm:$0xff]  }
   0xc   :  { %539 = vmatprep.subr.bf16.mxu0 %v556_v7  ;;  %v665_v49 = vrot.slane %v611_v9, %v134_v13  ;;  %v77_v52 = vadd.f32 %v73_v37, %v56_v42  ;;  %v78_v53 = vadd.f32 %v74_v38, %v57_v43  ;;  %v473_v54 = vunpack.c.l.bf16 %v516_v41 }
   0xd   :  { %v474_v55 = vunpack.c.h.bf16 %v516_v41  ;;  %v115_v57 = vmul.f32 %v457_v39, %v662_v46  ;;  %v116_v58 = vmul.f32 %v458_v40, %v662_v46  ;;  %v686_v0 = vrot.slane %v611_v9, %v155_v14  ;;  %v513_v40 = vld [vmem:[%s762_s0 + $0x48] sm:$0xff]  }
   0xe   :  { %v136_v59 = vmul.f32 %v465_v47, %v665_v49  ;;  %v137_v60 = vmul.f32 %v466_v48, %v665_v49  ;;  %v98_v62 = vadd.f32 %v94_v44, %v77_v52  ;;  %v99_v63 = vadd.f32 %v95_v45, %v78_v53  ;;  %v515_v45 = vld [vmem:[%s762_s0 + $0x58] sm:$0xff]  }
   0xf   :  { %540 = vmatpush3.bf16.msra.mxu0 %v556_v7  ;;  %v481_v1 = vunpack.c.l.bf16 %v518_v50  ;;  %v482_v4 = vunpack.c.h.bf16 %v518_v50  ;;  %v176_v5 = vsub.s32 7, %v597_v3  ;;  %v489_v6 = vunpack.c.l.bf16 %v520_v56 }
  0x10   :  { %541 = vmatprep.subr.bf16.mxu0 %v557_v31  ;;  %v490_v7 = vunpack.c.h.bf16 %v520_v56  ;;  %v119_v11 = vadd.f32 %v115_v57, %v98_v62  ;;  %v120_v12 = vadd.f32 %v116_v58, %v99_v63  ;;  %v157_v13 = vmul.f32 %v473_v54, %v686_v0 }
  0x11   :  { %v158_v14 = vmul.f32 %v474_v55, %v686_v0  ;;  %v701_v15 = vrot.slane %v611_v9, %v176_v5  ;;  %v199_v3 = vmul.f32 %v489_v6, %v683_v61  ;;  %v429_v18 = vunpack.c.l.bf16 %v505_v2  ;;  %v521_v6 = vld [vmem:[%s762_s0 + $0x88] sm:$0xff]  }
  0x12   :  { %v200_v16 = vmul.f32 %v490_v7, %v683_v61  ;;  %v140_v20 = vadd.f32 %v136_v59, %v119_v11  ;;  %v141_v21 = vadd.f32 %v137_v60, %v120_v12  ;;  %v430_v22 = vunpack.c.h.bf16 %v505_v2  ;;  %v517_v59 = vld [vmem:[%s762_s0 + $0x68] sm:$0xff]  }
  0x13   :  { %542 = vmatpush3.bf16.msra.mxu0 %v557_v31  ;;  %v437_v23 = vunpack.c.l.bf16 %v507_v8  ;;  %v178_v9 = vmul.f32 %v481_v1, %v701_v15  ;;  %v179_v26 = vmul.f32 %v482_v4, %v701_v15  ;;  %v37_v27 = vmul.f32 %v429_v18, %v621_v17  ;;  %v519_v1 = vld [vmem:[%s762_s0 + $0x78] sm:$0xff]  }
  0x14   :  { %543 = vmatprep.subr.bf16.mxu0 %v558_v51  ;;  %v438_v28 = vunpack.c.h.bf16 %v507_v8  ;;  %v161_v31 = vadd.f32 %v157_v13, %v140_v20  ;;  %v162_v32 = vadd.f32 %v158_v14, %v141_v21  ;;  %v38_v33 = vmul.f32 %v430_v22, %v621_v17  ;;  %v405_v17 = vld [vmem:[%s764_s2] ss:$0 sm:$0xff] }
  0x15   :  { %v54_v34 = vmul.f32 %v437_v23, %v627_v19  ;;  %v445_v37 = vunpack.c.l.bf16 %v509_v24  ;;  %v446_v38 = vunpack.c.h.bf16 %v509_v24  ;;  %v453_v39 = vunpack.c.l.bf16 %v511_v25 }
  0x16   :  { %v55_v36 = vmul.f32 %v438_v28, %v627_v19  ;;  %v182_v41 = vadd.f32 %v178_v9, %v161_v31  ;;  %v183_v42 = vadd.f32 %v179_v26, %v162_v32  ;;  %v454_v44 = vunpack.c.h.bf16 %v511_v25 }
  0x17   :  { %544 = vmatpush3.bf16.msra.mxu0 %v558_v51  ;;  %v58_v43 = vadd.f32 %v54_v34, %v37_v27  ;;  %v75_v47 = vmul.f32 %v445_v37, %v641_v29  ;;  %v76_v48 = vmul.f32 %v446_v38, %v641_v29  ;;  %v96_v50 = vmul.f32 %v453_v39, %v649_v35 }
  0x18   :  { %545 = vmatprep.subr.bf16.mxu0 %v559_v10  ;;  %v59_v19 = vadd.f32 %v55_v36, %v38_v33  ;;  %v203_v51 = vadd.f32 %v199_v3, %v182_v41  ;;  %v204_v52 = vadd.f32 %v200_v16, %v183_v42  ;;  %v97_v53 = vmul.f32 %v454_v44, %v649_v35 }
  0x19   :  { %v461_v54 = vunpack.c.l.bf16 %v513_v40  ;;  %v79_v55 = vadd.f32 %v75_v47, %v58_v43  ;;  %v462_v57 = vunpack.c.h.bf16 %v513_v40  ;;  %v469_v58 = vunpack.c.l.bf16 %v515_v45 }
  0x1a   :  { %v80_v56 = vadd.f32 %v76_v48, %v59_v19  ;;  %v214_v60 = vadd.f32 %v405_v17, %v203_v51  ;;  %v215_v62 = vadd.f32 %v405_v17, %v204_v52  ;;  %v470_v63 = vunpack.c.h.bf16 %v515_v45 }
  0x1b   :  { %546 = vmatpush3.bf16.msra.mxu0 %v559_v10  ;;  %v117_v29 = vmul.f32 %v461_v54, %v662_v46  ;;  %v100_v35 = vadd.f32 %v96_v50, %v79_v55  ;;  %v118_v4 = vmul.f32 %v462_v57, %v662_v46  ;;  %v138_v5 = vmul.f32 %v469_v58, %v665_v49 }
  0x1c   :  { %547 = vmatprep.subr.bf16.mxu0 %v560_v30  ;;  %v101_v2 = vadd.f32 %v97_v53, %v80_v56  ;;  %v218_v7 = vmax.f32 %v214_v60, 0.0  ;;  %v219_v8 = vmax.f32 %v215_v62, 0.0  ;;  %v139_v10 = vmul.f32 %v470_v63, %v665_v49 }
  0x1d   :  { %v477_v11 = vunpack.c.l.bf16 %v517_v59  ;;  %v121_v12 = vadd.f32 %v117_v29, %v100_v35  ;;  %v478_v14 = vunpack.c.h.bf16 %v517_v59  ;;  %v485_v3 = vunpack.c.l.bf16 %v519_v1 }
  0x1e   :  { %v122_v13 = vadd.f32 %v118_v4, %v101_v2  ;;  %v222_v16 = vpack.c.bf16 %v219_v8, %v218_v7  ;;  %v486_v20 = vunpack.c.h.bf16 %v519_v1  ;;  %v493_v46 = vunpack.c.l.bf16 %v521_v6 }
  0x1f   :  { %548 = vmatpush3.bf16.msra.mxu0 %v560_v30  ;;  %v159_v18 = vmul.f32 %v477_v11, %v686_v0  ;;  %v142_v21 = vadd.f32 %v138_v5, %v121_v12  ;;  %v160_v23 = vmul.f32 %v478_v14, %v686_v0  ;;  %v180_v24 = vmul.f32 %v485_v3, %v701_v15 }
  0x20   :  { %v143_v22 = vadd.f32 %v139_v10, %v122_v13  ;;  %549 = vmatprep.mubr.bf16.mxu0 %v222_v16  ;;  %v181_v25 = vmul.f32 %v486_v20, %v701_v15  ;;  %v494_v49 = vunpack.c.h.bf16 %v521_v6  ;;  %v201_v27 = vmul.f32 %v493_v46, %v683_v61  ;;  %v406_v15 = vld [vmem:[%s765_s4] ss:$0 sm:$0xff] }
  0x21   :  { %v163_v9 = vadd.f32 %v159_v18, %v142_v21 }
  0x22   :  { %v164_v26 = vadd.f32 %v160_v23, %v143_v22  ;;  %v202_v28 = vmul.f32 %v494_v49, %v683_v61 }
  0x23   :  { %v184_v30 = vadd.f32 %v180_v24, %v163_v9 }
  0x24   :  { %v185_v31 = vadd.f32 %v181_v25, %v164_v26 }
  0x25   :  { %v205_v32 = vadd.f32 %v201_v27, %v184_v30 }
  0x26   :  { %v206_v33 = vadd.f32 %v202_v28, %v185_v31 }
  0x27   :  { %v216_v34 = vadd.f32 %v405_v17, %v205_v32 }
  0x28   :  { %v217_v36 = vadd.f32 %v405_v17, %v206_v33 }
  0x29   :  { %v220_v37 = vmax.f32 %v216_v34, 0.0 }
  0x2a   :  { %v221_v0 = vmax.f32 %v217_v36, 0.0 }
  0x2c   :  { %v223_v38 = vpack.c.bf16 %v221_v0, %v220_v37 }
  0x2e   :  { %550 = vmatmul.mubr.bf16.vlgmr.msra.gmra.mxu0 %v223_v38 }
  0xee   :  { %v551_v39 = vpop.f32.mrf.mxu0 }
  0xef   :  { %v338_v41 = vadd.f32 %v551_v39, %v406_v15 }
  0xf0   :  { %v329_v40 = vpop.f32.mrf.mxu0 }
  0xf1   :  { %v330_v43 = vadd.f32 %v406_v15, %v329_v40  ;;  %v346_v45 = vmax.f32 %v338_v41, 0.0 }
  0xf2   :  { %v552_v42 = vpop.f32.mrf.mxu0 }
  0xf3   :  { %v341_v61 = vadd.f32 %v552_v42, %v406_v15  ;;  %v344_v48 = vmax.f32 %v330_v43, 0.0 }
  0xf4   :  { %v332_v44 = vpop.f32.mrf.mxu0 }
  0xf5   :  { %v347_v19 = vmax.f32 %v341_v61, 0.0  ;;  %v333_v47 = vadd.f32 %v406_v15, %v332_v44 }
  0xf7   :  { %v503_v17 = vpack.c.bf16 %v347_v19, %v346_v45  ;;  %v345_v50 = vmax.f32 %v333_v47, 0.0 }
  0xf9   :  { %522 = vst [vmem:[%s766_s5 + $0x8] sm:$0xff] %v503_v17   ;;  %v498_v51 = vpack.c.bf16 %v345_v50, %v344_v48 }
  0xfb   :  { %499 = vst [vmem:[%s766_s5] sm:$0xff] %v498_v51  }

// kernel: super_light_mobilenet_forward.7
= control target key start
LH: loop header
LB: loop body
LE: loop exit
PB: predicated region body
PF: predicated region fallthrough
CT: control target
= control target key end

     0   :  { %v1287_v3 = vmov 0   ;;  %vm241_vm0 = vcmask 1041409   ;;  %vm243_vm1 = vcmask 1042434   ;;  %vm245_vm2 = vcmask 1043459   ;;  %s1283_s1 = inlined_call_operand.vmem [shape: bf16[128,1024], index: 1, kind: input, shape index: {}]   ;;  %s1284_s0 = inlined_call_operand.vmem [shape: bf16[8,16,128], index: 0, kind: input, shape index: {}]   ;;  %s1285_s2 = inlined_call_operand.vmem [shape: f32[1,1024], index: 2, kind: input, shape index: {}]   ;;  %s1286_s3 = inlined_call_operand.vmem [shape: f32[8,1024], index: 3, kind: output, shape index: {}]  }
   0x1   :  { %v175_v0 = vld [vmem:[%s1283_s1 + $0x1c0] sm:$0xff]  ;;  %v176_v2 = vld [vmem:[%s1283_s1 + $0x1c8] sm:$0xff]  ;;  %609 = vmatprep.mubr.bf16.mxu0 %v1287_v3  ;;  %650 = vmatprep.mubr.bf16.mxu1 %v1287_v3  ;;  %vm247_vm3 = vcmask 1044484   ;;  %vm249_vm4 = vcmask 1045509   ;;  %vm251_vm5 = vcmask 1046534   ;;  %vm253_vm6 = vcmask 1047559  }
   0x2   :  { %v179_v1 = vld [vmem:[%s1283_s1 + $0x1e0] sm:$0xff]  ;;  %v180_v5 = vld [vmem:[%s1283_s1 + $0x1e8] sm:$0xff] }
   0x3   :  { %v810_v4 = vcombine.high %v175_v0, %v179_v1  ;;  %v809_v6 = vcombine.low %v175_v0, %v179_v1  ;;  %v167_v7 = vld [vmem:[%s1283_s1 + $0x180] sm:$0xff]  ;;  %v812_v9 = vcombine.high %v176_v2, %v180_v5  ;;  %v811_v10 = vcombine.low %v176_v2, %v180_v5  ;;  %v168_v12 = vld [vmem:[%s1283_s1 + $0x188] sm:$0xff] }
   0x4   :  { %v171_v8 = vld [vmem:[%s1283_s1 + $0x1a0] sm:$0xff]  ;;  %v172_v13 = vld [vmem:[%s1283_s1 + $0x1a8] sm:$0xff] }
   0x5   :  { %v802_v11 = vcombine.high %v167_v7, %v171_v8  ;;  %v907_v14 = vld [vmem:[%s1283_s1 + $0x140] sm:$0xff]  ;;  %577 = vmatprep.subr.bf16.mxu0 %v810_v4  ;;  %v804_v15 = vcombine.high %v168_v12, %v172_v13  ;;  %v917_v17 = vld [vmem:[%s1283_s1 + $0x148] sm:$0xff]  ;;  %618 = vmatprep.subr.bf16.mxu1 %v812_v9  ;;  %v801_v19 = vcombine.low %v167_v7, %v171_v8  ;;  %v851_v7 = vld [vmem:[%s1284_s0 + $0x18] sm:$0xff]  }
   0x6   :  { %v912_v16 = vld [vmem:[%s1283_s1 + $0x160] sm:$0xff]  ;;  %v922_v18 = vld [vmem:[%s1283_s1 + $0x168] sm:$0xff]  ;;  %578 = vmatpush1.bf16.msra.mxu0 %v809_v6  ;;  %v803_v20 = vcombine.low %v168_v12, %v172_v13  ;;  %619 = vmatpush1.bf16.msra.mxu1 %v811_v10  ;;  %v850_v6 = vld [vmem:[%s1284_s0 + $0x10] sm:$0xff]  }
   0x7   :  { %v927_v21 = vld [vmem:[%s1283_s1 + $0x100] sm:$0xff]  ;;  %v937_v23 = vld [vmem:[%s1283_s1 + $0x108] sm:$0xff]  ;;  %579 = vmatprep.subr.bf16.mxu0 %v802_v11  ;;  %v794_v24 = vcombine.high %v907_v14, %v912_v16  ;;  %v796_v25 = vcombine.high %v917_v17, %v922_v18  ;;  %v793_v26 = vcombine.low %v907_v14, %v912_v16  ;;  %620 = vmatprep.subr.bf16.mxu1 %v804_v15  ;;  %v827_v10 = vunpack.c.l.bf16 %v850_v6  ;;  %v854_v14 = vld [vmem:[%s1284_s0 + $0x30] sm:$0xff]  }
   0x8   :  { %v932_v22 = vld [vmem:[%s1283_s1 + $0x120] sm:$0xff]  ;;  %v948_v27 = vld [vmem:[%s1283_s1 + $0x128] sm:$0xff]  ;;  %v795_v30 = vcombine.low %v917_v17, %v922_v18  ;;  %v828_v11 = vunpack.c.h.bf16 %v850_v6  ;;  %v831_v15 = vunpack.c.l.bf16 %v851_v7  ;;  %v832_v16 = vunpack.c.h.bf16 %v851_v7 }
   0x9   :  { %v953_v28 = vld [vmem:[%s1283_s1 + $0xc0] sm:$0xff]  ;;  %v786_v31 = vcombine.high %v927_v21, %v932_v22  ;;  %v788_v32 = vcombine.high %v937_v23, %v948_v27  ;;  %v785_v33 = vcombine.low %v927_v21, %v932_v22  ;;  %v971_v34 = vld [vmem:[%s1283_s1 + $0xc8] sm:$0xff]  ;;  %v787_v37 = vcombine.low %v937_v23, %v948_v27 }
   0xa   :  { %v958_v29 = vld [vmem:[%s1283_s1 + $0xe0] sm:$0xff]  ;;  %v976_v35 = vld [vmem:[%s1283_s1 + $0xe8] sm:$0xff]  ;;  %580 = vmatpush1.bf16.msra.mxu0 %v801_v19  ;;  %621 = vmatpush1.bf16.msra.mxu1 %v803_v20  ;;  %v855_v19 = vld [vmem:[%s1284_s0 + $0x38] sm:$0xff]  }
   0xb   :  { %v981_v36 = vld [vmem:[%s1283_s1 + $0x80] sm:$0xff]  ;;  %v778_v38 = vcombine.high %v953_v28, %v958_v29  ;;  %v780_v39 = vcombine.high %v971_v34, %v976_v35  ;;  %v777_v40 = vcombine.low %v953_v28, %v958_v29  ;;  %v999_v42 = vld [vmem:[%s1283_s1 + $0x88] sm:$0xff]  ;;  %v779_v44 = vcombine.low %v971_v34, %v976_v35  ;;  %581 = vmatprep.subr.bf16.mxu0 %v794_v24 }
   0xc   :  { %v994_v41 = vld [vmem:[%s1283_s1 + $0xa0] sm:$0xff]  ;;  %v1004_v43 = vld [vmem:[%s1283_s1 + $0xa8] sm:$0xff]  ;;  %622 = vmatprep.subr.bf16.mxu1 %v796_v25  ;;  %v843_v25 = vunpack.c.l.bf16 %v854_v14 }
   0xd   :  { %v770_v45 = vcombine.high %v981_v36, %v994_v41  ;;  %v772_v46 = vcombine.high %v999_v42, %v1004_v43  ;;  %v769_v47 = vcombine.low %v981_v36, %v994_v41  ;;  %v1017_v48 = vld [vmem:[%s1283_s1 + $0x40] sm:$0xff]  ;;  %v1027_v50 = vld [vmem:[%s1283_s1 + $0x48] sm:$0xff]  ;;  %v771_v51 = vcombine.low %v999_v42, %v1004_v43 }
   0xe   :  { %v1022_v49 = vld [vmem:[%s1283_s1 + $0x60] sm:$0xff]  ;;  %v1036_v53 = vld [vmem:[%s1283_s1 + $0x68] sm:$0xff]  ;;  %582 = vmatpush1.bf16.msra.mxu0 %v793_v26  ;;  %623 = vmatpush1.bf16.msra.mxu1 %v795_v30  ;;  %v844_v26 = vunpack.c.h.bf16 %v854_v14  ;;  %v61_v30 = vadd.f32 %v828_v11, %v827_v10 }
   0xf   :  { %v762_v52 = vcombine.high %v1017_v48, %v1022_v49  ;;  %v761_v54 = vcombine.low %v1017_v48, %v1022_v49  ;;  %v1043_v55 = vld [vmem:[%s1283_s1] sm:$0xff]  ;;  %v764_v57 = vcombine.high %v1027_v50, %v1036_v53  ;;  %v763_v58 = vcombine.low %v1027_v50, %v1036_v53  ;;  %v1059_v60 = vld [vmem:[%s1283_s1 + $0x8] sm:$0xff]  ;;  %583 = vmatprep.subr.bf16.mxu0 %v786_v31 }
  0x10   :  { %v1048_v56 = vld [vmem:[%s1283_s1 + $0x20] sm:$0xff]  ;;  %v1064_v61 = vld [vmem:[%s1283_s1 + $0x28] sm:$0xff]  ;;  %624 = vmatprep.subr.bf16.mxu1 %v788_v32  ;;  %v68_v31 = vadd.f32 %v832_v16, %v831_v15  ;;  %v62_v21 = vrot.slane %v61_v30, 4 }
  0x11   :  { %v754_v59 = vcombine.high %v1043_v55, %v1048_v56  ;;  %v753_v62 = vcombine.low %v1043_v55, %v1048_v56  ;;  %v818_v63 = vld [vmem:[%s1284_s0] sm:$0xff]   ;;  %v756_v0 = vcombine.high %v1059_v60, %v1064_v61  ;;  %v755_v1 = vcombine.low %v1059_v60, %v1064_v61  ;;  %v849_v5 = vld [vmem:[%s1284_s0 + $0x8] sm:$0xff]   ;;  %v181_v55 = vld [vmem:[%s1283_s1 + $0x1f0] sm:$0xff] }
  0x12   :  { %v819_v2 = vunpack.c.l.bf16 %v818_v63  ;;  %v820_v4 = vunpack.c.h.bf16 %v818_v63  ;;  %v823_v8 = vunpack.c.l.bf16 %v849_v5  ;;  %v824_v9 = vunpack.c.h.bf16 %v849_v5  ;;  %v852_v12 = vld [vmem:[%s1284_s0 + $0x20] sm:$0xff]   ;;  %v853_v13 = vld [vmem:[%s1284_s0 + $0x28] sm:$0xff]   ;;  %584 = vmatpush1.bf16.msra.mxu0 %v785_v33  ;;  %625 = vmatpush1.bf16.msra.mxu1 %v787_v37  ;;  %v178_v56 = vld [vmem:[%s1283_s1 + $0x1d8] sm:$0xff] }
  0x13   :  { %v835_v17 = vunpack.c.l.bf16 %v852_v12  ;;  %v836_v18 = vunpack.c.h.bf16 %v852_v12  ;;  %v839_v20 = vunpack.c.l.bf16 %v853_v13  ;;  %v840_v24 = vunpack.c.h.bf16 %v853_v13  ;;  %585 = vmatprep.subr.bf16.mxu0 %v778_v38  ;;  %626 = vmatprep.subr.bf16.mxu1 %v780_v39 }
  0x14   :  { %v847_v63 = vunpack.c.l.bf16 %v855_v19  ;;  %v848_v5 = vunpack.c.h.bf16 %v855_v19  ;;  %v47_v6 = vadd.f32 %v820_v4, %v819_v2  ;;  %v54_v3 = vadd.f32 %v824_v9, %v823_v8 }
  0x15   :  { %v75_v7 = vadd.f32 %v836_v18, %v835_v17  ;;  %v82_v12 = vadd.f32 %v840_v24, %v839_v20  ;;  %v89_v2 = vadd.f32 %v844_v26, %v843_v25  ;;  %v69_v22 = vrot.slane %v68_v31, 4 }
  0x16   :  { %v48_v32 = vrot.slane %v47_v6, 4  ;;  %v55_v13 = vrot.slane %v54_v3, 4  ;;  %v96_v4 = vadd.f32 %v848_v5, %v847_v63  ;;  %586 = vmatpush1.bf16.msra.mxu0 %v777_v40  ;;  %v63_v37 = vadd.f32 %v62_v21, %v61_v30  ;;  %627 = vmatpush1.bf16.msra.mxu1 %v779_v44 }
  0x17   :  { %v76_v33 = vrot.slane %v75_v7, 4  ;;  %v83_v8 = vrot.slane %v82_v12, 4  ;;  %v90_v23 = vrot.slane %v89_v2, 4  ;;  %v70_v38 = vadd.f32 %v69_v22, %v68_v31  ;;  %587 = vmatprep.subr.bf16.mxu0 %v770_v45  ;;  %628 = vmatprep.subr.bf16.mxu1 %v772_v46 }
  0x18   :  { %v49_v9 = vadd.f32 %v48_v32, %v47_v6  ;;  %v56_v10 = vadd.f32 %v55_v13, %v54_v3  ;;  %v97_v27 = vrot.slane %v96_v4, 4  ;;  %v64_v28 = vrot.slane %v63_v37, 2 }
  0x19   :  { %v77_v11 = vadd.f32 %v76_v33, %v75_v7  ;;  %v84_v14 = vadd.f32 %v83_v8, %v82_v12  ;;  %v91_v15 = vadd.f32 %v90_v23, %v89_v2  ;;  %v71_v29 = vrot.slane %v70_v38, 2 }
  0x1a   :  { %v50_v39 = vrot.slane %v49_v9, 2  ;;  %v57_v3 = vrot.slane %v56_v10, 2  ;;  %v98_v16 = vadd.f32 %v97_v27, %v96_v4  ;;  %588 = vmatpush1.bf16.msra.mxu0 %v769_v47  ;;  %v65_v44 = vadd.f32 %v64_v28, %v63_v37  ;;  %629 = vmatpush1.bf16.msra.mxu1 %v771_v51  ;;  %v169_v28 = vld [vmem:[%s1283_s1 + $0x190] sm:$0xff] }
  0x1b   :  { %v78_v40 = vrot.slane %v77_v11, 2  ;;  %v85_v17 = vrot.slane %v84_v14, 2  ;;  %v92_v34 = vrot.slane %v91_v15, 2  ;;  %v72_v45 = vadd.f32 %v71_v29, %v70_v38  ;;  %589 = vmatprep.subr.bf16.mxu0 %v762_v52  ;;  %630 = vmatprep.subr.bf16.mxu1 %v764_v57 }
  0x1c   :  { %v51_v18 = vadd.f32 %v50_v39, %v49_v9  ;;  %v58_v19 = vadd.f32 %v57_v3, %v56_v10  ;;  %v99_v35 = vrot.slane %v98_v16, 2  ;;  %v66_v36 = vrot.slane %v65_v44, 1 }
  0x1d   :  { %v79_v20 = vadd.f32 %v78_v40, %v77_v11  ;;  %v86_v24 = vadd.f32 %v85_v17, %v84_v14  ;;  %v93_v26 = vadd.f32 %v92_v34, %v91_v15  ;;  %v73_v41 = vrot.slane %v72_v45, 1  ;;  %v173_v40 = vld [vmem:[%s1283_s1 + $0x1b0] sm:$0xff]  ;;  %v170_v17 = vld [vmem:[%s1283_s1 + $0x198] sm:$0xff] }
  0x1e   :  { %v52_v46 = vrot.slane %v51_v18, 1  ;;  %v59_v25 = vrot.slane %v58_v19, 1  ;;  %v100_v63 = vadd.f32 %v99_v35, %v98_v16  ;;  %590 = vmatpush1.bf16.msra.mxu0 %v761_v54  ;;  %v67_v52 = vadd.f32 %v66_v36, %v65_v44  ;;  %631 = vmatpush1.bf16.msra.mxu1 %v763_v58 }
  0x1f   :  { %v80_v47 = vrot.slane %v79_v20, 1  ;;  %v87_v5 = vrot.slane %v86_v24, 1  ;;  %v94_v43 = vrot.slane %v93_v26, 1  ;;  %v74_v30 = vadd.f32 %v73_v41, %v72_v45  ;;  %591 = vmatprep.subr.bf16.mxu0 %v754_v59  ;;  %632 = vmatprep.subr.bf16.mxu1 %v756_v0  ;;  %v177_v0 = vld [vmem:[%s1283_s1 + $0x1d0] sm:$0xff] }
  0x20   :  { %v53_v6 = vadd.f32 %v52_v46, %v51_v18  ;;  %v60_v42 = vadd.f32 %v59_v25, %v58_v19  ;;  %v101_v51 = vrot.slane %v100_v63, 1  ;;  %v105_v48 = vmul.f32 0.0625, %v67_v52  ;;  %v174_v18 = vld [vmem:[%s1283_s1 + $0x1b8] sm:$0xff]  ;;  %v161_v46 = vld [vmem:[%s1283_s1 + $0x150] sm:$0xff] }
  0x21   :  { %v81_v31 = vadd.f32 %v80_v47, %v79_v20  ;;  %v88_v7 = vadd.f32 %v87_v5, %v86_v24  ;;  %v95_v57 = vadd.f32 %v94_v43, %v93_v26  ;;  %v106_v49 = vmul.f32 0.0625, %v74_v30  ;;  %v165_v25 = vld [vmem:[%s1283_s1 + $0x170] sm:$0xff]  ;;  %v162_v26 = vld [vmem:[%s1283_s1 + $0x158] sm:$0xff] }
  0x22   :  { %v102_v12 = vadd.f32 %v101_v51, %v100_v63  ;;  %v103_v32 = vmul.f32 0.0625, %v53_v6  ;;  %v104_v13 = vmul.f32 0.0625, %v60_v42  ;;  %592 = vmatpush1.bf16.msra.mxu0 %v753_v62  ;;  %v113_v58 = vpack.c.bf16 %v105_v48, %v105_v48  ;;  %633 = vmatpush1.bf16.msra.mxu1 %v755_v1  ;;  %v182_v62 = vld [vmem:[%s1283_s1 + $0x1f8] sm:$0xff]  ;;  %v153_v6 = vld [vmem:[%s1283_s1 + $0x110] sm:$0xff] }
  0x23   :  { %v107_v54 = vmul.f32 0.0625, %v81_v31  ;;  %v108_v2 = vmul.f32 0.0625, %v88_v7  ;;  %v109_v4 = vmul.f32 0.0625, %v95_v57  ;;  %v114_v59 = vpack.c.bf16 %v106_v49, %v106_v49  ;;  %v166_v63 = vld [vmem:[%s1283_s1 + $0x178] sm:$0xff]  ;;  %v157_v42 = vld [vmem:[%s1283_s1 + $0x130] sm:$0xff] }
  0x24   :  { %v110_v21 = vmul.f32 0.0625, %v102_v12  ;;  %v111_v50 = vpack.c.bf16 %v103_v32, %v103_v32  ;;  %v112_v53 = vpack.c.bf16 %v104_v13, %v104_v13  ;;  %v235_v27 = vunpack.c.l.b16 %v113_v58  ;;  %v154_v43 = vld [vmem:[%s1283_s1 + $0x118] sm:$0xff]  ;;  %v145_v12 = vld [vmem:[%s1283_s1 + $0xd0] sm:$0xff] }
  0x25   :  { %v115_v22 = vpack.c.bf16 %v107_v54, %v107_v54  ;;  %v116_v33 = vpack.c.bf16 %v108_v2, %v108_v2  ;;  %v117_v8 = vpack.c.bf16 %v109_v4, %v109_v4  ;;  %v236_v37 = vunpack.c.l.b16 %v114_v59  ;;  %v158_v51 = vld [vmem:[%s1283_s1 + $0x138] sm:$0xff]  ;;  %v149_v32 = vld [vmem:[%s1283_s1 + $0xf0] sm:$0xff] }
  0x26   :  { %v118_v9 = vpack.c.bf16 %v110_v21, %v110_v21  ;;  %v233_v10 = vunpack.c.l.b16 %v111_v50  ;;  %v234_v23 = vunpack.c.l.b16 %v112_v53  ;;  %v814_v14 = vcombine.high %v177_v0, %v181_v55  ;;  %v146_v13 = vld [vmem:[%s1283_s1 + $0xd8] sm:$0xff]  ;;  %v137_v21 = vld [vmem:[%s1283_s1 + $0x90] sm:$0xff] }
  0x27   :  { %v237_v60 = vunpack.c.l.b16 %v115_v22  ;;  %v238_v61 = vunpack.c.l.b16 %v116_v33  ;;  %v239_v38 = vunpack.c.l.b16 %v117_v8  ;;  %v816_v39 = vcombine.high %v178_v56, %v182_v62  ;;  %v150_v48 = vld [vmem:[%s1283_s1 + $0xf8] sm:$0xff]  ;;  %v141_v50 = vld [vmem:[%s1283_s1 + $0xb0] sm:$0xff] }
  0x28   :  { %v242_v1 = vsel %vm241_vm0, %v234_v23, %v233_v10  ;;  %v240_v3 = vunpack.c.l.b16 %v118_v9  ;;  %659 = vmatprep.subr.bf16.mxu0 %v814_v14  ;;  %v813_v35 = vcombine.low %v177_v0, %v181_v55  ;;  %v815_v44 = vcombine.low %v178_v56, %v182_v62  ;;  %v138_v53 = vld [vmem:[%s1283_s1 + $0x98] sm:$0xff]  ;;  %v129_v8 = vld [vmem:[%s1283_s1 + $0x50] sm:$0xff] }
  0x29   :  { %v244_v11 = vsel %vm243_vm1, %v235_v27, %v242_v1  ;;  %700 = vmatprep.subr.bf16.mxu1 %v816_v39  ;;  %v806_v20 = vcombine.high %v169_v28, %v173_v40  ;;  %v808_v24 = vcombine.high %v170_v17, %v174_v18  ;;  %v805_v36 = vcombine.low %v169_v28, %v173_v40  ;;  %v142_v58 = vld [vmem:[%s1283_s1 + $0xb8] sm:$0xff]  ;;  %v133_v9 = vld [vmem:[%s1283_s1 + $0x70] sm:$0xff] }
  0x2a   :  { %v246_v15 = vsel %vm245_vm2, %v236_v37, %v244_v11  ;;  %v807_v41 = vcombine.low %v170_v17, %v174_v18  ;;  %v798_v47 = vcombine.high %v161_v46, %v165_v25  ;;  %v800_v5 = vcombine.high %v162_v26, %v166_v63  ;;  %v130_v10 = vld [vmem:[%s1283_s1 + $0x58] sm:$0xff]  ;;  %v121_v37 = vld [vmem:[%s1283_s1 + $0x10] sm:$0xff]  ;;  %v183_v17 = vld [vmem:[%s1285_s2] sm:$0xff] }
  0x2b   :  { %v248_v16 = vsel %vm247_vm3, %v237_v60, %v246_v15  ;;  %v1289_v52 = vmov 0   ;;  %v797_v30 = vcombine.low %v161_v46, %v165_v25  ;;  %v799_v31 = vcombine.low %v162_v26, %v166_v63  ;;  %v134_v23 = vld [vmem:[%s1283_s1 + $0x78] sm:$0xff]  ;;  %v125_v60 = vld [vmem:[%s1283_s1 + $0x30] sm:$0xff] }
  0x2c   :  { %v250_v29 = vsel %vm249_vm4, %v238_v61, %v248_v16  ;;  %v790_v7 = vcombine.high %v153_v6, %v157_v42  ;;  %v792_v57 = vcombine.high %v154_v43, %v158_v51  ;;  %v789_v49 = vcombine.low %v153_v6, %v157_v42  ;;  %v122_v61 = vld [vmem:[%s1283_s1 + $0x18] sm:$0xff] }
  0x2d   :  { %v252_v19 = vsel %vm251_vm5, %v239_v38, %v250_v29  ;;  %v791_v54 = vcombine.low %v154_v43, %v158_v51  ;;  %v782_v2 = vcombine.high %v145_v12, %v149_v32  ;;  %v784_v4 = vcombine.high %v146_v13, %v150_v48  ;;  %v126_v1 = vld [vmem:[%s1283_s1 + $0x38] sm:$0xff] }
  0x2e   :  { %v254_v34 = vsel %vm253_vm6, %v240_v3, %v252_v19  ;;  %v781_v59 = vcombine.low %v145_v12, %v149_v32  ;;  %v783_v22 = vcombine.low %v146_v13, %v150_v48  ;;  %v774_v33 = vcombine.high %v137_v21, %v141_v50 }
  0x2f   :  { %v1176_v45 = vpack.c.b16 %v254_v34, %v254_v34  ;;  %v776_v0 = vcombine.high %v138_v53, %v142_v58  ;;  %v773_v55 = vcombine.low %v137_v21, %v141_v50  ;;  %v775_v56 = vcombine.low %v138_v53, %v142_v58 }
  0x30   :  { %v766_v62 = vcombine.high %v129_v8, %v133_v9  ;;  %v768_v27 = vcombine.high %v130_v10, %v134_v23  ;;  %v765_v38 = vcombine.low %v129_v8, %v133_v9  ;;  %v767_v11 = vcombine.low %v130_v10, %v134_v23 }
  0x31   :  { %610 = vmatmul.mubr.bf16.vlgmr.msra.gmra.mxu0 %v1176_v45  ;;  %651 = vmatmul.mubr.bf16.vlgmr.msra.gmra.mxu1 %v1176_v45  ;;  %v758_v14 = vcombine.high %v121_v37, %v125_v60  ;;  %v760_v39 = vcombine.high %v122_v61, %v126_v1  ;;  %v757_v3 = vcombine.low %v121_v37, %v125_v60  ;;  %v185_v16 = vlaneseq }
  0x32   :  { %660 = vmatpush1.bf16.msra.mxu0 %v813_v35  ;;  %701 = vmatpush1.bf16.msra.mxu1 %v815_v44  ;;  %v759_v15 = vcombine.low %v122_v61, %v126_v1 }
  0x33   :  { %661 = vmatprep.subr.bf16.mxu0 %v806_v20  ;;  %702 = vmatprep.subr.bf16.mxu1 %v808_v24  ;;  %v186_v28 = vshrl.u32 %v185_v16, 7 }
  0x34   :  { %691 = vmatprep.mubr.bf16.mxu0 %v1289_v52  ;;  %732 = vmatprep.mubr.bf16.mxu1 %v1289_v52 }
  0x35   :  { %v187_v29 = vsub.s32 0, %v186_v28  ;;  %v195_v40 = vsub.s32 2, %v186_v28  ;;  %v191_v18 = vsub.s32 1, %v186_v28  ;;  %v199_v19 = vsub.s32 3, %v186_v28 }
  0x36   :  { %662 = vmatpush1.bf16.msra.mxu0 %v805_v36  ;;  %703 = vmatpush1.bf16.msra.mxu1 %v807_v41  ;;  %v203_v43 = vsub.s32 4, %v186_v28  ;;  %v211_v51 = vsub.s32 6, %v186_v28  ;;  %v207_v52 = vsub.s32 5, %v186_v28 }
  0x37   :  { %663 = vmatprep.subr.bf16.mxu0 %v798_v47  ;;  %704 = vmatprep.subr.bf16.mxu1 %v800_v5  ;;  %v188_v34 = vrot.slane %v183_v17, %v187_v29  ;;  %v196_v35 = vrot.slane %v183_v17, %v195_v40  ;;  %v192_v44 = vrot.slane %v183_v17, %v191_v18 }
  0x38   :  { %v200_v20 = vrot.slane %v183_v17, %v199_v19 }
  0x3a   :  { %664 = vmatpush1.bf16.msra.mxu0 %v797_v30  ;;  %705 = vmatpush1.bf16.msra.mxu1 %v799_v31  ;;  %v215_v30 = vsub.s32 7, %v186_v28  ;;  %v204_v31 = vrot.slane %v183_v17, %v203_v43 }
  0x3b   :  { %665 = vmatprep.subr.bf16.mxu0 %v790_v7  ;;  %706 = vmatprep.subr.bf16.mxu1 %v792_v57  ;;  %v212_v7 = vrot.slane %v183_v17, %v211_v51  ;;  %v208_v57 = vrot.slane %v183_v17, %v207_v52 }
  0x3c   :  { %v216_v12 = vrot.slane %v183_v17, %v215_v30 }
  0x3e   :  { %666 = vmatpush1.bf16.msra.mxu0 %v789_v49  ;;  %707 = vmatpush1.bf16.msra.mxu1 %v791_v54 }
  0x3f   :  { %667 = vmatprep.subr.bf16.mxu0 %v782_v2  ;;  %708 = vmatprep.subr.bf16.mxu1 %v784_v4 }
  0x42   :  { %668 = vmatpush1.bf16.msra.mxu0 %v781_v59  ;;  %709 = vmatpush1.bf16.msra.mxu1 %v783_v22 }
  0x43   :  { %669 = vmatprep.subr.bf16.mxu0 %v774_v33  ;;  %710 = vmatprep.subr.bf16.mxu1 %v776_v0 }
  0x46   :  { %670 = vmatpush1.bf16.msra.mxu0 %v773_v55  ;;  %711 = vmatpush1.bf16.msra.mxu1 %v775_v56 }
  0x47   :  { %671 = vmatprep.subr.bf16.mxu0 %v766_v62  ;;  %712 = vmatprep.subr.bf16.mxu1 %v768_v27 }
  0x4a   :  { %672 = vmatpush1.bf16.msra.mxu0 %v765_v38  ;;  %713 = vmatpush1.bf16.msra.mxu1 %v767_v11 }
  0x4b   :  { %673 = vmatprep.subr.bf16.mxu0 %v758_v14  ;;  %714 = vmatprep.subr.bf16.mxu1 %v760_v39 }
  0x4e   :  { %674 = vmatpush1.bf16.msra.mxu0 %v757_v3  ;;  %715 = vmatpush1.bf16.msra.mxu1 %v759_v15 }
  0x51   :  { %692 = vmatmul.mubr.bf16.vlgmr.msra.gmra.mxu0 %v1176_v45  ;;  %733 = vmatmul.mubr.bf16.vlgmr.msra.gmra.mxu1 %v1176_v45 }
  0xf1   :  { %v611_v24 = vpop.f32.mrf.mxu0  ;;  %v652_v46 = vpop.f32.mrf.mxu1 }
  0xf2   :  { %v612_v25 = vadd.f32 %v611_v24, %v188_v34  ;;  %v653_v26 = vadd.f32 %v652_v46, %v196_v35 }
  0xf3   :  { %v613_v63 = vpop.f32.mrf.mxu0  ;;  %v654_v45 = vpop.f32.mrf.mxu1 }
  0xf4   :  { %741 = vst [vmem:[%s1286_s3] sm:$0xff] %v612_v25  ;;  %743 = vst [vmem:[%s1286_s3 + $0x10] sm:$0xff] %v653_v26  ;;  %v614_v36 = vadd.f32 %v613_v63, %v192_v44  ;;  %v655_v41 = vadd.f32 %v654_v45, %v200_v20 }
  0xf5   :  { %v615_v47 = vpop.f32.mrf.mxu0  ;;  %v656_v5 = vpop.f32.mrf.mxu1 }
  0xf6   :  { %742 = vst [vmem:[%s1286_s3 + $0x8] sm:$0xff] %v614_v36  ;;  %744 = vst [vmem:[%s1286_s3 + $0x18] sm:$0xff] %v655_v41 }
  0xf7   :  { %v616_v6 = vpop.f32.mrf.mxu0  ;;  %v657_v42 = vpop.f32.mrf.mxu1 }
 0x111   :  { %v693_v32 = vpop.f32.mrf.mxu0  ;;  %v734_v13 = vpop.f32.mrf.mxu1 }
 0x112   :  { %v694_v48 = vadd.f32 %v693_v32, %v204_v31  ;;  %v735_v49 = vadd.f32 %v734_v13, %v212_v7 }
 0x113   :  { %v695_v54 = vpop.f32.mrf.mxu0  ;;  %v736_v2 = vpop.f32.mrf.mxu1 }
 0x114   :  { %745 = vst [vmem:[%s1286_s3 + $0x20] sm:$0xff] %v694_v48  ;;  %747 = vst [vmem:[%s1286_s3 + $0x30] sm:$0xff] %v735_v49  ;;  %v696_v4 = vadd.f32 %v695_v54, %v208_v57  ;;  %v737_v21 = vadd.f32 %v736_v2, %v216_v12 }
 0x115   :  { %v697_v50 = vpop.f32.mrf.mxu0  ;;  %v738_v53 = vpop.f32.mrf.mxu1 }
 0x116   :  { %746 = vst [vmem:[%s1286_s3 + $0x28] sm:$0xff] %v696_v4  ;;  %748 = vst [vmem:[%s1286_s3 + $0x38] sm:$0xff] %v737_v21 }
 0x117   :  { %v698_v58 = vpop.f32.mrf.mxu0  ;;  %v739_v59 = vpop.f32.mrf.mxu1 }

</bundles_post_ra>
